<compile_context>
chip_gen: v7x
topology: tpu7x:2x2x1
jax: 0.10.0
libtpu: 0.0.40
codegen_flags: <defaults>
</compile_context>

<pallas_src>
from functools import partial

import numpy as np
import jax
import jax.numpy as jnp
from jax.experimental import pallas as pl
from jax.experimental.pallas import tpu as pltpu


# --------------------------------------------------------------------------
# Fused whole-network kernel
# --------------------------------------------------------------------------
def _make_fused_tcn_kernel(B, L, CMAX, K, PAD0, meta, FOUT):
    """meta: tuple of (dilation, pad, has_downsample) per residual block."""
    BL = B * L

    def kernel(*refs):
        x_ref = refs[0]
        idx = 1
        layer_refs = []
        for (_, _, has_down) in meta:
            n = 6 if has_down else 4
            layer_refs.append(refs[idx:idx + n])
            idx += n
        wf_ref, bf_ref = refs[idx], refs[idx + 1]
        o_ref = refs[idx + 2]
        buf = refs[idx + 3]                      # bf16 VMEM scratch (B, PAD0 + L, CMAX)

        # Zero ONLY the pad rows [0, PAD0): they are never written afterwards and
        # supply the causal left-padding for every layer (pad <= PAD0).  The
        # activation region [PAD0, PAD0+L) is fully overwritten before each use.
        # Padded channel lanes stay zero because weights/biases are zero-padded.
        buf[:, :PAD0, :] = jnp.zeros((B, PAD0, CMAX), jnp.bfloat16)

        # Current activation in f32 (accumulator precision), batch folded into M.
        act = x_ref[...].reshape(BL, CMAX)

        for (d, pad, has_down), lrefs in zip(meta, layer_refs):
            if has_down:
                w1_ref, b1_ref, w2_ref, b2_ref, wd_ref, bd_ref = lrefs
            else:
                w1_ref, b1_ref, w2_ref, b2_ref = lrefs

            base = PAD0 - pad                     # rows [base, PAD0) are zeros
            x_bf = act.astype(jnp.bfloat16)       # bf16 MXU operand

            # ---- conv1 (dilated, causal) + bias + ReLU ----
            buf[:, PAD0:, :] = x_bf.reshape(B, L, CMAX)
            # Unshifted tap (j == K-1) uses the live value: no buf round-trip.
            acc = jnp.dot(x_bf, w1_ref[K - 1], preferred_element_type=jnp.float32)
            for j in range(K - 1):
                s = base + j * d
                xs = buf[:, s:s + L, :].reshape(BL, CMAX)
                acc = acc + jnp.dot(xs, w1_ref[j], preferred_element_type=jnp.float32)
            h = jnp.maximum(acc + b1_ref[...], 0.0)
            # TODO(synk): dropout layers omitted (eval-mode identity).

            # ---- conv2 (dilated, causal) + bias + ReLU ----
            h_bf = h.astype(jnp.bfloat16)
            buf[:, PAD0:, :] = h_bf.reshape(B, L, CMAX)
            acc2 = jnp.dot(h_bf, w2_ref[K - 1], preferred_element_type=jnp.float32)
            for j in range(K - 1):
                s = base + j * d
                hs = buf[:, s:s + L, :].reshape(BL, CMAX)
                acc2 = acc2 + jnp.dot(hs, w2_ref[j], preferred_element_type=jnp.float32)
            y = jnp.maximum(acc2 + b2_ref[...], 0.0)

            # ---- residual (1x1 conv if channel count changes) + final ReLU ----
            if has_down:
                res = jnp.dot(x_bf, wd_ref[...],
                              preferred_element_type=jnp.float32) + bd_ref[...]
            else:
                res = act
            act = jnp.maximum(y + res, 0.0)

        # ---- final Linear on the last timestep, fused into the same kernel ----
        last = act.reshape(B, L, CMAX)[:, L - 1, :].astype(jnp.bfloat16)   # (B, CMAX)
        o_ref[...] = (jnp.dot(last, wf_ref[...],
                              preferred_element_type=jnp.float32) + bf_ref[...])

    return kernel


def _pad_to(a, target_shape):
    return jnp.pad(a, [(0, t - s) for s, t in zip(a.shape, target_shape)])


# --------------------------------------------------------------------------
# One-time parameter prep: pad channels to 128 lanes, cast matmul weights to bf16.
# (Hoisted out of the per-call forward path per perf review.)
# --------------------------------------------------------------------------
def prepare_tcn_params(block_params, wf, bf, K, cmax=128, fout=128):
    args = []
    meta = []
    for (w1, b1, w2, b2, wd, bd, d) in block_params:
        has_down = wd is not None
        args += [_pad_to(w1, (K, cmax, cmax)).astype(jnp.bfloat16),
                 _pad_to(b1, (1, cmax)).astype(jnp.float32),
                 _pad_to(w2, (K, cmax, cmax)).astype(jnp.bfloat16),
                 _pad_to(b2, (1, cmax)).astype(jnp.float32)]
        if has_down:
            args += [_pad_to(wd, (cmax, cmax)).astype(jnp.bfloat16),
                     _pad_to(bd, (1, cmax)).astype(jnp.float32)]
        meta.append((d, (K - 1) * d, has_down))
    args += [_pad_to(wf, (cmax, fout)).astype(jnp.bfloat16),
             _pad_to(bf, (1, fout)).astype(jnp.float32)]

    pads = [p for (_, p, _) in meta]
    PAD0 = max(8, ((max(pads) + 7) // 8) * 8)     # sublane-aligned causal pad region
    args = tuple(jnp.asarray(a) for a in args)    # materialize on device once
    return args, tuple(meta), PAD0


# --------------------------------------------------------------------------
# Forward: only the input is padded per call; weights are already prepped.
# --------------------------------------------------------------------------
@partial(jax.jit, static_argnames=("meta", "PAD0", "K", "cmax", "fout"))
def tcn_model_forward(x, params, meta, PAD0, K, cmax, fout):
    """Full TCNModel forward: x (B, L, Cin) NLC  ->  (B, 1)."""
    B, L, Cin = x.shape
    assert L % 8 == 0, "L must be a multiple of 8 for the batch-fold reshape"

    xp = _pad_to(x, (B, L, cmax)).astype(jnp.float32)  # zero-pad channels to 128 lanes
    kernel = _make_fused_tcn_kernel(B, L, cmax, K, PAD0, meta, fout)
    out = pl.pallas_call(
        kernel,
        out_shape=jax.ShapeDtypeStruct((B, fout), jnp.float32),
        scratch_shapes=[pltpu.VMEM((B, PAD0 + L, cmax), jnp.bfloat16)],
        compiler_params=pltpu.CompilerParams(vmem_limit_bytes=32 * 1024 * 1024),
    )(xp, *params)
    return out[:, :1]                             # lane-dense store, slice to (B, 1)


# --------------------------------------------------------------------------
# Pure-JAX f32 reference for correctness check
# --------------------------------------------------------------------------
def ref_block(x, w1, b1, w2, b2, wd, bd, d, K):
    B, L, Cin = x.shape
    pad = (K - 1) * d

    def conv(inp_padded, w, b):
        acc = 0.0
        for j in range(K):
            acc = acc + jnp.einsum('blc,co->blo',
                                   inp_padded[:, j * d: j * d + L, :], w[j])
        return acc + b

    xp = jnp.pad(x, ((0, 0), (pad, 0), (0, 0)))
    h = jax.nn.relu(conv(xp, w1, b1))
    hp = jnp.pad(h, ((0, 0), (pad, 0), (0, 0)))
    y = jax.nn.relu(conv(hp, w2, b2))
    res = x if wd is None else jnp.einsum('blc,co->blo', x, wd) + bd
    return jax.nn.relu(y + res)


# --------------------------------------------------------------------------
if __name__ == "__main__":
    B, L = 2, 16
    input_channels = 4
    num_channels = [8, 8]
    K = 3  # kernel_size

    key = jax.random.PRNGKey(0)
    key, kx = jax.random.split(key)
    x = jax.random.normal(kx, (B, L, input_channels), jnp.float32)

    # Deterministic parameter init (effective weights; weight-norm folded in).
    params = []
    cin = input_channels
    for i, cout in enumerate(num_channels):
        key, k1, k2, k3, k4, k5, k6 = jax.random.split(key, 7)
        w1 = 0.1 * jax.random.normal(k1, (K, cin, cout), jnp.float32)
        b1 = 0.1 * jax.random.normal(k2, (1, cout), jnp.float32)
        w2 = 0.1 * jax.random.normal(k3, (K, cout, cout), jnp.float32)
        b2 = 0.1 * jax.random.normal(k4, (1, cout), jnp.float32)
        if cin != cout:
            wd = 0.1 * jax.random.normal(k5, (cin, cout), jnp.float32)
            bd = 0.1 * jax.random.normal(k6, (1, cout), jnp.float32)
        else:
            wd, bd = None, None
        params.append((w1, b1, w2, b2, wd, bd, 2 ** i))
        cin = cout
    key, kf1, kf2 = jax.random.split(key, 3)
    wf = 0.1 * jax.random.normal(kf1, (num_channels[-1], 1), jnp.float32)
    bf = 0.1 * jax.random.normal(kf2, (1, 1), jnp.float32)

    # ---- one-time weight prep (pad + bf16 cast, off the per-call path) ----
    prepped, meta, PAD0 = prepare_tcn_params(params, wf, bf, K)

    # ---- Pallas fused forward ----
    out = tcn_model_forward(x, prepped, meta, PAD0, K, 128, 128)
    out = jax.block_until_ready(out)

    # ---- f32 reference forward ----
    hr = x
    for (w1, b1, w2, b2, wd, bd, d) in params:
        hr = ref_block(hr, w1, b1, w2, b2, wd, bd, d, K)
    ref_out = hr[:, -1, :] @ wf + bf

    assert out.shape == (B, 1)
    # bf16 MXU operands (f32 accumulation): tolerance relaxed vs the f32 reference.
    np.testing.assert_allclose(np.asarray(out), np.asarray(ref_out),
                               rtol=2e-2, atol=2e-2)
    print("KERNEL_OK")
</pallas_src>

<mosaic_0001>
module attributes {stable_mosaic.version = 11 : i64} {
  func.func @kernel(%arg0: memref<2x16x128xf32, #tpu.memory_space<vmem>>, %arg1: memref<3x128x128xbf16, #tpu.memory_space<vmem>>, %arg2: memref<1x128xf32, #tpu.memory_space<vmem>>, %arg3: memref<3x128x128xbf16, #tpu.memory_space<vmem>>, %arg4: memref<1x128xf32, #tpu.memory_space<vmem>>, %arg5: memref<128x128xbf16, #tpu.memory_space<vmem>>, %arg6: memref<1x128xf32, #tpu.memory_space<vmem>>, %arg7: memref<3x128x128xbf16, #tpu.memory_space<vmem>>, %arg8: memref<1x128xf32, #tpu.memory_space<vmem>>, %arg9: memref<3x128x128xbf16, #tpu.memory_space<vmem>>, %arg10: memref<1x128xf32, #tpu.memory_space<vmem>>, %arg11: memref<128x128xbf16, #tpu.memory_space<vmem>>, %arg12: memref<1x128xf32, #tpu.memory_space<vmem>>, %arg13: memref<2x128xf32, #tpu.memory_space<vmem>>, %arg14: memref<2x24x128xbf16, #tpu.memory_space<vmem>>) attributes {dimension_semantics = [], scalar_prefetch = 0 : i64, scratch_operands = 1 : i64, tpu.core_type = #tpu.core_type<tc>} {
    %cst = arith.constant 0.000000e+00 : bf16
    %0 = vector.broadcast %cst : bf16 to vector<2x8x128xbf16>
    %c0 = arith.constant 0 : index
    %c0_0 = arith.constant 0 : index
    %c0_1 = arith.constant 0 : index
    %1 = vector.load %arg14[%c0, %c0_0, %c0_1] : memref<2x24x128xbf16, #tpu.memory_space<vmem>>, vector<2x8x128xbf16>
    tpu.vector_store %arg14[%c0, %c0_0, %c0_1], %0 {strides = array<i32>} : memref<2x24x128xbf16, #tpu.memory_space<vmem>>, vector<2x8x128xbf16>,
    %c0_2 = arith.constant 0 : index
    %c0_3 = arith.constant 0 : index
    %c0_4 = arith.constant 0 : index
    %2 = vector.load %arg0[%c0_2, %c0_3, %c0_4] : memref<2x16x128xf32, #tpu.memory_space<vmem>>, vector<2x16x128xf32>
    %3 = vector.shape_cast %2 : vector<2x16x128xf32> to vector<32x128xf32>
    %4 = arith.truncf %3 : vector<32x128xf32> to vector<32x128xbf16>
    %5 = vector.shape_cast %4 : vector<32x128xbf16> to vector<2x16x128xbf16>
    %c0_5 = arith.constant 0 : index
    %c8 = arith.constant 8 : index
    %c0_6 = arith.constant 0 : index
    %6 = vector.load %arg14[%c0_5, %c8, %c0_6] : memref<2x24x128xbf16, #tpu.memory_space<vmem>>, vector<2x16x128xbf16>
    tpu.vector_store %arg14[%c0_5, %c8, %c0_6], %5 {strides = array<i32>} : memref<2x24x128xbf16, #tpu.memory_space<vmem>>, vector<2x16x128xbf16>,
    %c2 = arith.constant 2 : index
    %c0_7 = arith.constant 0 : index
    %c0_8 = arith.constant 0 : index
    %7 = vector.load %arg1[%c2, %c0_7, %c0_8] : memref<3x128x128xbf16, #tpu.memory_space<vmem>>, vector<1x128x128xbf16>
    %8 = vector.shape_cast %7 : vector<1x128x128xbf16> to vector<128x128xbf16>
    %cst_9 = arith.constant dense<0.000000e+00> : vector<32x128xf32>
    %9 = tpu.matmul %4, %8, %cst_9 {dimension_numbers = #tpu.dot_dimension_numbers<[1], [0], [0], [1], [0, 0, 1, 1], [], []>} : vector<32x128xbf16>, vector<128x128xbf16>, vector<32x128xf32> -> vector<32x128xf32>
    %c0_10 = arith.constant 0 : index
    %c6 = arith.constant 6 : index
    %c0_11 = arith.constant 0 : index
    %10 = vector.load %arg14[%c0_10, %c6, %c0_11] : memref<2x24x128xbf16, #tpu.memory_space<vmem>>, vector<2x16x128xbf16>
    %11 = vector.shape_cast %10 : vector<2x16x128xbf16> to vector<32x128xbf16>
    %c0_12 = arith.constant 0 : index
    %c0_13 = arith.constant 0 : index
    %c0_14 = arith.constant 0 : index
    %12 = vector.load %arg1[%c0_12, %c0_13, %c0_14] : memref<3x128x128xbf16, #tpu.memory_space<vmem>>, vector<1x128x128xbf16>
    %13 = vector.shape_cast %12 : vector<1x128x128xbf16> to vector<128x128xbf16>
    %cst_15 = arith.constant dense<0.000000e+00> : vector<32x128xf32>
    %14 = tpu.matmul %11, %13, %cst_15 {dimension_numbers = #tpu.dot_dimension_numbers<[1], [0], [0], [1], [0, 0, 1, 1], [], []>} : vector<32x128xbf16>, vector<128x128xbf16>, vector<32x128xf32> -> vector<32x128xf32>
    %15 = arith.addf %9, %14 : vector<32x128xf32>
    %c0_16 = arith.constant 0 : index
    %c7 = arith.constant 7 : index
    %c0_17 = arith.constant 0 : index
    %16 = vector.load %arg14[%c0_16, %c7, %c0_17] : memref<2x24x128xbf16, #tpu.memory_space<vmem>>, vector<2x16x128xbf16>
    %17 = vector.shape_cast %16 : vector<2x16x128xbf16> to vector<32x128xbf16>
    %c1 = arith.constant 1 : index
    %c0_18 = arith.constant 0 : index
    %c0_19 = arith.constant 0 : index
    %18 = vector.load %arg1[%c1, %c0_18, %c0_19] : memref<3x128x128xbf16, #tpu.memory_space<vmem>>, vector<1x128x128xbf16>
    %19 = vector.shape_cast %18 : vector<1x128x128xbf16> to vector<128x128xbf16>
    %cst_20 = arith.constant dense<0.000000e+00> : vector<32x128xf32>
    %20 = tpu.matmul %17, %19, %cst_20 {dimension_numbers = #tpu.dot_dimension_numbers<[1], [0], [0], [1], [0, 0, 1, 1], [], []>} : vector<32x128xbf16>, vector<128x128xbf16>, vector<32x128xf32> -> vector<32x128xf32>
    %21 = arith.addf %15, %20 : vector<32x128xf32>
    %c0_21 = arith.constant 0 : index
    %c0_22 = arith.constant 0 : index
    %22 = vector.load %arg2[%c0_21, %c0_22] : memref<1x128xf32, #tpu.memory_space<vmem>>, vector<1x128xf32>
    %23 = vector.broadcast %22 : vector<1x128xf32> to vector<32x128xf32>
    %24 = arith.addf %21, %23 : vector<32x128xf32>
    %cst_23 = arith.constant 0.000000e+00 : f32
    %25 = vector.broadcast %cst_23 : f32 to vector<32x128xf32>
    %26 = arith.maximumf %24, %25 : vector<32x128xf32>
    %27 = arith.truncf %26 : vector<32x128xf32> to vector<32x128xbf16>
    %28 = vector.shape_cast %27 : vector<32x128xbf16> to vector<2x16x128xbf16>
    %c0_24 = arith.constant 0 : index
    %c8_25 = arith.constant 8 : index
    %c0_26 = arith.constant 0 : index
    %29 = vector.load %arg14[%c0_24, %c8_25, %c0_26] : memref<2x24x128xbf16, #tpu.memory_space<vmem>>, vector<2x16x128xbf16>
    tpu.vector_store %arg14[%c0_24, %c8_25, %c0_26], %28 {strides = array<i32>} : memref<2x24x128xbf16, #tpu.memory_space<vmem>>, vector<2x16x128xbf16>,
    %c2_27 = arith.constant 2 : index
    %c0_28 = arith.constant 0 : index
    %c0_29 = arith.constant 0 : index
    %30 = vector.load %arg3[%c2_27, %c0_28, %c0_29] : memref<3x128x128xbf16, #tpu.memory_space<vmem>>, vector<1x128x128xbf16>
    %31 = vector.shape_cast %30 : vector<1x128x128xbf16> to vector<128x128xbf16>
    %cst_30 = arith.constant dense<0.000000e+00> : vector<32x128xf32>
    %32 = tpu.matmul %27, %31, %cst_30 {dimension_numbers = #tpu.dot_dimension_numbers<[1], [0], [0], [1], [0, 0, 1, 1], [], []>} : vector<32x128xbf16>, vector<128x128xbf16>, vector<32x128xf32> -> vector<32x128xf32>
    %c0_31 = arith.constant 0 : index
    %c6_32 = arith.constant 6 : index
    %c0_33 = arith.constant 0 : index
    %33 = vector.load %arg14[%c0_31, %c6_32, %c0_33] : memref<2x24x128xbf16, #tpu.memory_space<vmem>>, vector<2x16x128xbf16>
    %34 = vector.shape_cast %33 : vector<2x16x128xbf16> to vector<32x128xbf16>
    %c0_34 = arith.constant 0 : index
    %c0_35 = arith.constant 0 : index
    %c0_36 = arith.constant 0 : index
    %35 = vector.load %arg3[%c0_34, %c0_35, %c0_36] : memref<3x128x128xbf16, #tpu.memory_space<vmem>>, vector<1x128x128xbf16>
    %36 = vector.shape_cast %35 : vector<1x128x128xbf16> to vector<128x128xbf16>
    %cst_37 = arith.constant dense<0.000000e+00> : vector<32x128xf32>
    %37 = tpu.matmul %34, %36, %cst_37 {dimension_numbers = #tpu.dot_dimension_numbers<[1], [0], [0], [1], [0, 0, 1, 1], [], []>} : vector<32x128xbf16>, vector<128x128xbf16>, vector<32x128xf32> -> vector<32x128xf32>
    %38 = arith.addf %32, %37 : vector<32x128xf32>
    %c0_38 = arith.constant 0 : index
    %c7_39 = arith.constant 7 : index
    %c0_40 = arith.constant 0 : index
    %39 = vector.load %arg14[%c0_38, %c7_39, %c0_40] : memref<2x24x128xbf16, #tpu.memory_space<vmem>>, vector<2x16x128xbf16>
    %40 = vector.shape_cast %39 : vector<2x16x128xbf16> to vector<32x128xbf16>
    %c1_41 = arith.constant 1 : index
    %c0_42 = arith.constant 0 : index
    %c0_43 = arith.constant 0 : index
    %41 = vector.load %arg3[%c1_41, %c0_42, %c0_43] : memref<3x128x128xbf16, #tpu.memory_space<vmem>>, vector<1x128x128xbf16>
    %42 = vector.shape_cast %41 : vector<1x128x128xbf16> to vector<128x128xbf16>
    %cst_44 = arith.constant dense<0.000000e+00> : vector<32x128xf32>
    %43 = tpu.matmul %40, %42, %cst_44 {dimension_numbers = #tpu.dot_dimension_numbers<[1], [0], [0], [1], [0, 0, 1, 1], [], []>} : vector<32x128xbf16>, vector<128x128xbf16>, vector<32x128xf32> -> vector<32x128xf32>
    %44 = arith.addf %38, %43 : vector<32x128xf32>
    %c0_45 = arith.constant 0 : index
    %c0_46 = arith.constant 0 : index
    %45 = vector.load %arg4[%c0_45, %c0_46] : memref<1x128xf32, #tpu.memory_space<vmem>>, vector<1x128xf32>
    %46 = vector.broadcast %45 : vector<1x128xf32> to vector<32x128xf32>
    %47 = arith.addf %44, %46 : vector<32x128xf32>
    %cst_47 = arith.constant 0.000000e+00 : f32
    %48 = vector.broadcast %cst_47 : f32 to vector<32x128xf32>
    %49 = arith.maximumf %47, %48 : vector<32x128xf32>
    %c0_48 = arith.constant 0 : index
    %c0_49 = arith.constant 0 : index
    %50 = vector.load %arg5[%c0_48, %c0_49] : memref<128x128xbf16, #tpu.memory_space<vmem>>, vector<128x128xbf16>
    %cst_50 = arith.constant dense<0.000000e+00> : vector<32x128xf32>
    %51 = tpu.matmul %4, %50, %cst_50 {dimension_numbers = #tpu.dot_dimension_numbers<[1], [0], [0], [1], [0, 0, 1, 1], [], []>} : vector<32x128xbf16>, vector<128x128xbf16>, vector<32x128xf32> -> vector<32x128xf32>
    %c0_51 = arith.constant 0 : index
    %c0_52 = arith.constant 0 : index
    %52 = vector.load %arg6[%c0_51, %c0_52] : memref<1x128xf32, #tpu.memory_space<vmem>>, vector<1x128xf32>
    %53 = vector.broadcast %52 : vector<1x128xf32> to vector<32x128xf32>
    %54 = arith.addf %51, %53 : vector<32x128xf32>
    %55 = arith.addf %49, %54 : vector<32x128xf32>
    %cst_53 = arith.constant 0.000000e+00 : f32
    %56 = vector.broadcast %cst_53 : f32 to vector<32x128xf32>
    %57 = arith.maximumf %55, %56 : vector<32x128xf32>
    %58 = arith.truncf %57 : vector<32x128xf32> to vector<32x128xbf16>
    %59 = vector.shape_cast %58 : vector<32x128xbf16> to vector<2x16x128xbf16>
    %c0_54 = arith.constant 0 : index
    %c8_55 = arith.constant 8 : index
    %c0_56 = arith.constant 0 : index
    %60 = vector.load %arg14[%c0_54, %c8_55, %c0_56] : memref<2x24x128xbf16, #tpu.memory_space<vmem>>, vector<2x16x128xbf16>
    tpu.vector_store %arg14[%c0_54, %c8_55, %c0_56], %59 {strides = array<i32>} : memref<2x24x128xbf16, #tpu.memory_space<vmem>>, vector<2x16x128xbf16>,
    %c2_57 = arith.constant 2 : index
    %c0_58 = arith.constant 0 : index
    %c0_59 = arith.constant 0 : index
    %61 = vector.load %arg7[%c2_57, %c0_58, %c0_59] : memref<3x128x128xbf16, #tpu.memory_space<vmem>>, vector<1x128x128xbf16>
    %62 = vector.shape_cast %61 : vector<1x128x128xbf16> to vector<128x128xbf16>
    %cst_60 = arith.constant dense<0.000000e+00> : vector<32x128xf32>
    %63 = tpu.matmul %58, %62, %cst_60 {dimension_numbers = #tpu.dot_dimension_numbers<[1], [0], [0], [1], [0, 0, 1, 1], [], []>} : vector<32x128xbf16>, vector<128x128xbf16>, vector<32x128xf32> -> vector<32x128xf32>
    %c0_61 = arith.constant 0 : index
    %c4 = arith.constant 4 : index
    %c0_62 = arith.constant 0 : index
    %64 = vector.load %arg14[%c0_61, %c4, %c0_62] : memref<2x24x128xbf16, #tpu.memory_space<vmem>>, vector<2x16x128xbf16>
    %65 = vector.shape_cast %64 : vector<2x16x128xbf16> to vector<32x128xbf16>
    %c0_63 = arith.constant 0 : index
    %c0_64 = arith.constant 0 : index
    %c0_65 = arith.constant 0 : index
    %66 = vector.load %arg7[%c0_63, %c0_64, %c0_65] : memref<3x128x128xbf16, #tpu.memory_space<vmem>>, vector<1x128x128xbf16>
    %67 = vector.shape_cast %66 : vector<1x128x128xbf16> to vector<128x128xbf16>
    %cst_66 = arith.constant dense<0.000000e+00> : vector<32x128xf32>
    %68 = tpu.matmul %65, %67, %cst_66 {dimension_numbers = #tpu.dot_dimension_numbers<[1], [0], [0], [1], [0, 0, 1, 1], [], []>} : vector<32x128xbf16>, vector<128x128xbf16>, vector<32x128xf32> -> vector<32x128xf32>
    %69 = arith.addf %63, %68 : vector<32x128xf32>
    %c0_67 = arith.constant 0 : index
    %c6_68 = arith.constant 6 : index
    %c0_69 = arith.constant 0 : index
    %70 = vector.load %arg14[%c0_67, %c6_68, %c0_69] : memref<2x24x128xbf16, #tpu.memory_space<vmem>>, vector<2x16x128xbf16>
    %71 = vector.shape_cast %70 : vector<2x16x128xbf16> to vector<32x128xbf16>
    %c1_70 = arith.constant 1 : index
    %c0_71 = arith.constant 0 : index
    %c0_72 = arith.constant 0 : index
    %72 = vector.load %arg7[%c1_70, %c0_71, %c0_72] : memref<3x128x128xbf16, #tpu.memory_space<vmem>>, vector<1x128x128xbf16>
    %73 = vector.shape_cast %72 : vector<1x128x128xbf16> to vector<128x128xbf16>
    %cst_73 = arith.constant dense<0.000000e+00> : vector<32x128xf32>
    %74 = tpu.matmul %71, %73, %cst_73 {dimension_numbers = #tpu.dot_dimension_numbers<[1], [0], [0], [1], [0, 0, 1, 1], [], []>} : vector<32x128xbf16>, vector<128x128xbf16>, vector<32x128xf32> -> vector<32x128xf32>
    %75 = arith.addf %69, %74 : vector<32x128xf32>
    %c0_74 = arith.constant 0 : index
    %c0_75 = arith.constant 0 : index
    %76 = vector.load %arg8[%c0_74, %c0_75] : memref<1x128xf32, #tpu.memory_space<vmem>>, vector<1x128xf32>
    %77 = vector.broadcast %76 : vector<1x128xf32> to vector<32x128xf32>
    %78 = arith.addf %75, %77 : vector<32x128xf32>
    %cst_76 = arith.constant 0.000000e+00 : f32
    %79 = vector.broadcast %cst_76 : f32 to vector<32x128xf32>
    %80 = arith.maximumf %78, %79 : vector<32x128xf32>
    %81 = arith.truncf %80 : vector<32x128xf32> to vector<32x128xbf16>
    %82 = vector.shape_cast %81 : vector<32x128xbf16> to vector<2x16x128xbf16>
    %c0_77 = arith.constant 0 : index
    %c8_78 = arith.constant 8 : index
    %c0_79 = arith.constant 0 : index
    %83 = vector.load %arg14[%c0_77, %c8_78, %c0_79] : memref<2x24x128xbf16, #tpu.memory_space<vmem>>, vector<2x16x128xbf16>
    tpu.vector_store %arg14[%c0_77, %c8_78, %c0_79], %82 {strides = array<i32>} : memref<2x24x128xbf16, #tpu.memory_space<vmem>>, vector<2x16x128xbf16>,
    %c2_80 = arith.constant 2 : index
    %c0_81 = arith.constant 0 : index
    %c0_82 = arith.constant 0 : index
    %84 = vector.load %arg9[%c2_80, %c0_81, %c0_82] : memref<3x128x128xbf16, #tpu.memory_space<vmem>>, vector<1x128x128xbf16>
    %85 = vector.shape_cast %84 : vector<1x128x128xbf16> to vector<128x128xbf16>
    %cst_83 = arith.constant dense<0.000000e+00> : vector<32x128xf32>
    %86 = tpu.matmul %81, %85, %cst_83 {dimension_numbers = #tpu.dot_dimension_numbers<[1], [0], [0], [1], [0, 0, 1, 1], [], []>} : vector<32x128xbf16>, vector<128x128xbf16>, vector<32x128xf32> -> vector<32x128xf32>
    %c0_84 = arith.constant 0 : index
    %c4_85 = arith.constant 4 : index
    %c0_86 = arith.constant 0 : index
    %87 = vector.load %arg14[%c0_84, %c4_85, %c0_86] : memref<2x24x128xbf16, #tpu.memory_space<vmem>>, vector<2x16x128xbf16>
    %88 = vector.shape_cast %87 : vector<2x16x128xbf16> to vector<32x128xbf16>
    %c0_87 = arith.constant 0 : index
    %c0_88 = arith.constant 0 : index
    %c0_89 = arith.constant 0 : index
    %89 = vector.load %arg9[%c0_87, %c0_88, %c0_89] : memref<3x128x128xbf16, #tpu.memory_space<vmem>>, vector<1x128x128xbf16>
    %90 = vector.shape_cast %89 : vector<1x128x128xbf16> to vector<128x128xbf16>
    %cst_90 = arith.constant dense<0.000000e+00> : vector<32x128xf32>
    %91 = tpu.matmul %88, %90, %cst_90 {dimension_numbers = #tpu.dot_dimension_numbers<[1], [0], [0], [1], [0, 0, 1, 1], [], []>} : vector<32x128xbf16>, vector<128x128xbf16>, vector<32x128xf32> -> vector<32x128xf32>
    %92 = arith.addf %86, %91 : vector<32x128xf32>
    %c0_91 = arith.constant 0 : index
    %c6_92 = arith.constant 6 : index
    %c0_93 = arith.constant 0 : index
    %93 = vector.load %arg14[%c0_91, %c6_92, %c0_93] : memref<2x24x128xbf16, #tpu.memory_space<vmem>>, vector<2x16x128xbf16>
    %94 = vector.shape_cast %93 : vector<2x16x128xbf16> to vector<32x128xbf16>
    %c1_94 = arith.constant 1 : index
    %c0_95 = arith.constant 0 : index
    %c0_96 = arith.constant 0 : index
    %95 = vector.load %arg9[%c1_94, %c0_95, %c0_96] : memref<3x128x128xbf16, #tpu.memory_space<vmem>>, vector<1x128x128xbf16>
    %96 = vector.shape_cast %95 : vector<1x128x128xbf16> to vector<128x128xbf16>
    %cst_97 = arith.constant dense<0.000000e+00> : vector<32x128xf32>
    %97 = tpu.matmul %94, %96, %cst_97 {dimension_numbers = #tpu.dot_dimension_numbers<[1], [0], [0], [1], [0, 0, 1, 1], [], []>} : vector<32x128xbf16>, vector<128x128xbf16>, vector<32x128xf32> -> vector<32x128xf32>
    %98 = arith.addf %92, %97 : vector<32x128xf32>
    %c0_98 = arith.constant 0 : index
    %c0_99 = arith.constant 0 : index
    %99 = vector.load %arg10[%c0_98, %c0_99] : memref<1x128xf32, #tpu.memory_space<vmem>>, vector<1x128xf32>
    %100 = vector.broadcast %99 : vector<1x128xf32> to vector<32x128xf32>
    %101 = arith.addf %98, %100 : vector<32x128xf32>
    %cst_100 = arith.constant 0.000000e+00 : f32
    %102 = vector.broadcast %cst_100 : f32 to vector<32x128xf32>
    %103 = arith.maximumf %101, %102 : vector<32x128xf32>
    %104 = arith.addf %103, %57 : vector<32x128xf32>
    %cst_101 = arith.constant 0.000000e+00 : f32
    %105 = vector.broadcast %cst_101 : f32 to vector<32x128xf32>
    %106 = arith.maximumf %104, %105 : vector<32x128xf32>
    %107 = vector.shape_cast %106 : vector<32x128xf32> to vector<2x16x128xf32>
    %108 = vector.extract_strided_slice %107 {offsets = [0, 15, 0], sizes = [2, 1, 128], strides = [1, 1, 1]} : vector<2x16x128xf32> to vector<2x1x128xf32>
    %109 = vector.shape_cast %108 : vector<2x1x128xf32> to vector<2x128xf32>
    %110 = arith.truncf %109 : vector<2x128xf32> to vector<2x128xbf16>
    %c0_102 = arith.constant 0 : index
    %c0_103 = arith.constant 0 : index
    %111 = vector.load %arg11[%c0_102, %c0_103] : memref<128x128xbf16, #tpu.memory_space<vmem>>, vector<128x128xbf16>
    %cst_104 = arith.constant dense<0.000000e+00> : vector<2x128xf32>
    %112 = tpu.matmul %110, %111, %cst_104 {dimension_numbers = #tpu.dot_dimension_numbers<[1], [0], [0], [1], [0, 0, 1, 1], [], []>} : vector<2x128xbf16>, vector<128x128xbf16>, vector<2x128xf32> -> vector<2x128xf32>
    %c0_105 = arith.constant 0 : index
    %c0_106 = arith.constant 0 : index
    %113 = vector.load %arg12[%c0_105, %c0_106] : memref<1x128xf32, #tpu.memory_space<vmem>>, vector<1x128xf32>
    %114 = vector.broadcast %113 : vector<1x128xf32> to vector<2x128xf32>
    %115 = arith.addf %112, %114 : vector<2x128xf32>
    %c0_107 = arith.constant 0 : index
    %c0_108 = arith.constant 0 : index
    %116 = vector.load %arg13[%c0_107, %c0_108] : memref<2x128xf32, #tpu.memory_space<vmem>>, vector<2x128xf32>
    tpu.vector_store %arg13[%c0_107, %c0_108], %115 {strides = array<i32>} : memref<2x128xf32, #tpu.memory_space<vmem>>, vector<2x128xf32>,
    return
  }
}

</mosaic_0001>

<bundles_post_ra>
// kernel: tcn_model_forward.1
= control target key start
LH: loop header
LB: loop body
LE: loop exit
PB: predicated region body
PF: predicated region fallthrough
CT: control target
= control target key end

     0   :  { %18 = vsyncpa [#allocation4], 0  ;;  %s3467_s0 = inlined_call_operand.vmem [shape: f32[2,16,128], index: 0, kind: input, shape index: {}]   ;;  %s3468_s1 = inlined_call_operand.hbm [shape: bf16[3,128,128], index: 1, kind: input, shape index: {}]   ;;  %s3469_s2 = inlined_call_operand.vmem [shape: f32[1,128], index: 2, kind: input, shape index: {}]   ;;  %s3470_s3 = inlined_call_operand.hbm [shape: bf16[3,128,128], index: 3, kind: input, shape index: {}]   ;;  %s3471_s4 = inlined_call_operand.vmem [shape: f32[1,128], index: 4, kind: input, shape index: {}]   ;;  %s3472_s5 = inlined_call_operand.vmem [shape: bf16[128,128], index: 5, kind: input, shape index: {}]   ;;  %s3473_s6 = inlined_call_operand.vmem [shape: f32[1,128], index: 6, kind: input, shape index: {}]   ;;  %s3474_s7 = inlined_call_operand.hbm [shape: bf16[3,128,128], index: 7, kind: input, shape index: {}]   ;;  %s3475_s8 = inlined_call_operand.vmem [shape: f32[1,128], index: 8, kind: input, shape index: {}]   ;;  %s3476_s9 = inlined_call_operand.hbm [shape: bf16[3,128,128], index: 9, kind: input, shape index: {}]   ;;  %s3477_s10 = inlined_call_operand.vmem [shape: f32[1,128], index: 10, kind: input, shape index: {}]   ;;  %s3478_s11 = inlined_call_operand.vmem [shape: bf16[128,128], index: 11, kind: input, shape index: {}]   ;;  %s3479_s12 = inlined_call_operand.vmem [shape: f32[1,128], index: 12, kind: input, shape index: {}]   ;;  %s3480_s13 = inlined_call_operand.vmem [shape: f32[2,128], index: 13, kind: output, shape index: {}]  }
   0x1   :  { %19 = vsyncpa [#allocation6], 0 }
   0x2   :  { %20 = vsyncpa [#allocation9], 0  ;;  %s3054_s25 = smov [#allocation5]   ;;  %s3055_s27 = smov [#allocation3]  }
   0x3   :  { %s42_s26 = sshll.u32 %s3054_s25, 4  ;;  %s28_s28 = sshll.u32 %s3055_s27, 4  ;;  %s43_s26 = int_to_ptr.vmem [resolvable:$true] %s42_s26  ;;  %s3133_s28 = int_to_ptr.vmem [resolvable:$true] %s28_s28 }
   0x4   :  { %s2960_s14 = scalar_lea.hbm %s3470_s3, 3072 }
   0x5   :  { %p2961_p0 = scmp.ne.s32.totalorder %s3470_s3, %s2960_s14  ;;  %p2964_p1 = scmp.lt.u32.totalorder %s2960_s14, %s3470_s3 }
   0x7   :  { %p2966_p2 = pnand %p2964_p1, %p2961_p0 }
   0x9   :  { %2969 = shalt.err (!%p2966_p2)
}
   0xa   :  { %s2970_s19 = scalar_lea.vmem %s43_s26, 3072  ;;  %p2975_p4 = scmp.lt.s32.totalorder %s43_s26, %s43_s26 }
   0xb   :  { %p2971_p3 = scmp.ne.s32.totalorder %s43_s26, %s2970_s19  ;;  %p2976_p5 = scmp.lt.s32.totalorder %s2970_s19, %s2970_s19 }
   0xd   :  { %p2977_p6 = por %p2976_p5, %p2975_p4 }
   0xf   :  { %p2978_p7 = pnand %p2977_p6, %p2971_p3 }
  0x11   :  { %2981 = shalt.err (!%p2978_p7)
}
  0x12   :  { %s3056_s20 = smov 64   ;;  %s3057_s21 = smov 4  }
  0x13   :  { %48 = dma.hbm_to_vmem [thread:$0]  %s3470_s3, 3072, %s43_s26, [#allocation6], %s3056_s20, %s3056_s20, %s3057_s21  }
  0x14   :  { %s2982_s27 = scalar_lea.hbm %s3468_s1, 3072 }
  0x15   :  { %p2983_p8 = scmp.ne.s32.totalorder %s3468_s1, %s2982_s27  ;;  %p2986_p9 = scmp.lt.u32.totalorder %s2982_s27, %s3468_s1 }
  0x17   :  { %p2988_p10 = pnand %p2986_p9, %p2983_p8 }
  0x19   :  { %2991 = shalt.err (!%p2988_p10)
}
  0x1a   :  { %s2992_s16 = scalar_lea.vmem %s3133_s28, 3072  ;;  %p2997_p12 = scmp.lt.s32.totalorder %s3133_s28, %s3133_s28 }
  0x1b   :  { %p2993_p11 = scmp.ne.s32.totalorder %s3133_s28, %s2992_s16  ;;  %p2998_p13 = scmp.lt.s32.totalorder %s2992_s16, %s2992_s16 }
  0x1d   :  { %p2999_p0 = por %p2998_p13, %p2997_p12 }
  0x1f   :  { %p3000_p1 = pnand %p2999_p0, %p2993_p11 }
  0x21   :  { %3003 = shalt.err (!%p3000_p1)
}
  0x22   :  { %34 = dma.hbm_to_vmem [thread:$0]  %s3468_s1, 3072, %s3133_s28, [#allocation4], %s3056_s20, %s3056_s20, %s3057_s21  }
  0x23   :  { %s3058_s17 = smov [#allocation7]   ;;  %s3059_s19 = smov [#allocation8]  }
  0x24   :  { %s60_s18 = sshll.u32 %s3058_s17, 4  ;;  %s74_s22 = sshll.u32 %s3059_s19, 4  ;;  %s61_s18 = int_to_ptr.vmem [resolvable:$true] %s60_s18  ;;  %s3170_s22 = int_to_ptr.vmem [resolvable:$true] %s74_s22 }
  0x25   :  { %s3004_s25 = scalar_lea.hbm %s3474_s7, 3072 }
  0x26   :  { %p3005_p2 = scmp.ne.s32.totalorder %s3474_s7, %s3004_s25  ;;  %p3008_p3 = scmp.lt.u32.totalorder %s3004_s25, %s3474_s7 }
  0x28   :  { %p3010_p4 = pnand %p3008_p3, %p3005_p2 }
  0x2a   :  { %3013 = shalt.err (!%p3010_p4)
}
  0x2b   :  { %s3014_s1 = scalar_lea.vmem %s61_s18, 3072  ;;  %p3019_p6 = scmp.lt.s32.totalorder %s61_s18, %s61_s18 }
  0x2c   :  { %p3015_p5 = scmp.ne.s32.totalorder %s61_s18, %s3014_s1  ;;  %p3020_p7 = scmp.lt.s32.totalorder %s3014_s1, %s3014_s1 }
  0x2e   :  { %p3021_p8 = por %p3020_p7, %p3019_p6 }
  0x30   :  { %p3022_p9 = pnand %p3021_p8, %p3015_p5 }
  0x32   :  { %3025 = shalt.err (!%p3022_p9)
}
  0x33   :  { %66 = dma.hbm_to_vmem [thread:$0]  %s3474_s7, 3072, %s61_s18, [#allocation6], %s3056_s20, %s3056_s20, %s3057_s21  }
  0x34   :  { %s3026_s26 = scalar_lea.hbm %s3476_s9, 3072 }
  0x35   :  { %p3027_p10 = scmp.ne.s32.totalorder %s3476_s9, %s3026_s26  ;;  %p3030_p11 = scmp.lt.u32.totalorder %s3026_s26, %s3476_s9 }
  0x37   :  { %p3032_p12 = pnand %p3030_p11, %p3027_p10 }
  0x39   :  { %3035 = shalt.err (!%p3032_p12)
}
  0x3a   :  { %s3036_s25 = scalar_lea.vmem %s3170_s22, 3072  ;;  %p3041_p0 = scmp.lt.s32.totalorder %s3170_s22, %s3170_s22 }
  0x3b   :  { %p3037_p13 = scmp.ne.s32.totalorder %s3170_s22, %s3036_s25  ;;  %p3042_p1 = scmp.lt.s32.totalorder %s3036_s25, %s3036_s25 }
  0x3d   :  { %p3043_p2 = por %p3042_p1, %p3041_p0 }
  0x3f   :  { %p3044_p3 = pnand %p3043_p2, %p3037_p13 }
  0x41   :  { %3047 = shalt.err (!%p3044_p3)
}
  0x42   :  { %80 = dma.hbm_to_vmem [thread:$0]  %s3476_s9, 3072, %s3170_s22, [#allocation9], %s3056_s20, %s3056_s20, %s3057_s21  }
  0x43   :  { %3048 = dma.done.wait [#allocation4], 3072  }
  0x44   :  { %3049 = vsyncadd [#allocation4], 4294964224 }
  0x45   :  { %3050 = dma.done.wait [#allocation6], 6144  }
  0x46   :  { %3051 = vsyncadd [#allocation6], 4294961152 }
  0x47   :  { %3052 = dma.done.wait [#allocation9], 3072  }
  0x48   :  { %3053 = vsyncadd [#allocation9], 4294964224  ;;  %v3060_v0 = vmov 0   ;;  %v2848_v1 = vld [vmem:[#allocation3] sm:$0xff]   ;;  %v2849_v2 = vld [vmem:[#allocation3 + $0x8] sm:$0xff]   ;;  %vm155_vm0 = vcmask 1040384  }
  0x49   :  { %100 = vst [vmem:[#allocation2] sm:$0xf] %v3060_v0  ;;  %101 = vst [vmem:[#allocation2 + $0xc] sm:$0xf] %v3060_v0  ;;  %2535 = vmatprep.subr.bf16.mxu0 %v2848_v1  ;;  %v2850_v3 = vld [vmem:[#allocation3 + $0x10] sm:$0xff]   ;;  %v2851_v4 = vld [vmem:[#allocation3 + $0x18] sm:$0xff]  }
  0x4a   :  { %2536 = vmatpush3.bf16.msra.mxu0 %v2848_v1  ;;  %v3210_v5 = vld [vmem:[%s3467_s0] sm:$0xff]  ;;  %v3215_v6 = vld [vmem:[%s3467_s0 + $0x8] sm:$0xff]  ;;  %v104_v9 = vld [vmem:[%s3467_s0 + $0x10] sm:$0xff]  ;;  %vm156_vm1 = vcmask 1044484   ;;  %vm392_vm3 = vsmask.f32 256 }
  0x4b   :  { %2537 = vmatprep.subr.bf16.mxu0 %v2849_v2  ;;  %v2356_v7 = vpack.c.bf16 %v3210_v5, %v3210_v5  ;;  %v2357_v8 = vpack.c.bf16 %v3215_v6, %v3215_v6  ;;  %v105_v10 = vld [vmem:[%s3467_s0 + $0x18] sm:$0xff]  ;;  %v2853_v14 = vld [vmem:[#allocation3 + $0x28] sm:$0xff]   ;;  %vm3230_vm2 = vmor %vm155_vm0, %vm156_vm1  ;;  %v3267_v58 = vpack.c.bf16 %v3215_v6, %v3210_v5  ;;  %vm393_vm4 = vsmask.f32 4368 }
  0x4c   :  { %v3227_v11 = vpack.c.bf16 %v105_v10, %v104_v9  ;;  %v2852_v12 = vld [vmem:[#allocation3 + $0x20] sm:$0xff]   ;;  %v2854_v18 = vld [vmem:[#allocation3 + $0x30] sm:$0xff]   ;;  %v2855_v34 = vld [vmem:[#allocation3 + $0x38] sm:$0xff]   ;;  %vm1225_vm6 = vcmask 1041408   ;;  %vm1226_vm7 = vcmask 1045508   ;;  %vm3062_vm9 = vmmov 0  }
  0x4d   :  { %122 = vst [vmem:[#allocation2 + $0x4] sm:$0xf] %v2356_v7  ;;  %123 = vst [vmem:[#allocation2 + $0x8] sm:$0xf] %v2357_v8  ;;  %v2856_v38 = vld [vmem:[#allocation3 + $0x80] sm:$0xff]   ;;  %v2857_v53 = vld [vmem:[#allocation3 + $0x88] sm:$0xff]  }
  0x4e   :  { %2538 = vmatpush3.bf16.msra.mxu0 %v2849_v2  ;;  %2392 = vst [vmem:[#allocation2 + $0x10] sm:$0xff] %v3227_v11   ;;  %v2872_v56 = vld [vmem:[#allocation5] sm:$0xff]   ;;  %v2873_v57 = vld [vmem:[#allocation5 + $0x8] sm:$0xff]   ;;  %v2874_v62 = vld [vmem:[#allocation5 + $0x10] sm:$0xff]   ;;  %vm2090_vm10 = vcmask 1041409  }
  0x4f   :  { %2539 = vmatprep.subr.bf16.mxu0 %v2850_v3  ;;  %2595 = vmatprep.subr.bf16.mxu1 %v2872_v56  ;;  %v2858_v63 = vld [vmem:[#allocation3 + $0x90] sm:$0xff]   ;;  %v2859_v0 = vld [vmem:[#allocation3 + $0x98] sm:$0xff]   ;;  %v2860_v1 = vld [vmem:[#allocation3 + $0xa0] sm:$0xff]  }
  0x50   :  { %v143_v13 = vld [vmem:[#allocation2] sm:$0x8]  ;;  %v146_v15 = vld [vmem:[#allocation2 + $0xc] sm:$0x8]  ;;  %2596 = vmatpush3.bf16.msra.mxu1 %v2872_v56  ;;  %vm3271_vm5 = vmor %vm392_vm3, %vm393_vm4 }
  0x51   :  { %v2194_v17 = vrot.slane %v143_v13, 11  ;;  %v396_v23 = vshrl.u32 %v143_v13, 16  ;;  %v2195_v24 = vrot.slane %v146_v15, 11  ;;  %v418_v30 = vshrl.u32 %v146_v15, 16  ;;  %2597 = vmatprep.subr.bf16.mxu1 %v2873_v57  ;;  %v2861_v2 = vld [vmem:[#allocation3 + $0xa8] sm:$0xff]   ;;  %v2863_v5 = vld [vmem:[#allocation3 + $0xb8] sm:$0xff]   ;;  %vm3379_vm8 = vmor %vm1225_vm6, %vm1226_vm7 }
  0x52   :  { %2540 = vmatpush3.bf16.msra.mxu0 %v2850_v3  ;;  %v2864_v8 = vld [vmem:[#allocation3 + $0x40] sm:$0xff]   ;;  %v2867_v15 = vld [vmem:[#allocation3 + $0x58] sm:$0xff]   ;;  %v617_v56 = vld [vmem:[#allocation2] sm:$0x8] }
  0x53   :  { %2541 = vmatprep.subr.bf16.mxu0 %v2851_v4  ;;  %v3245_v37 = vrot.slane %v396_v23, 11  ;;  %v3253_v42 = vrot.slane %v418_v30, 11  ;;  %v2879_v30 = vld [vmem:[#allocation5 + $0x38] sm:$0xff]   ;;  %v2908_v3 = vld [vmem:[#allocation7 + $0x20] sm:$0xff]  }
  0x54   :  { %v3234_v19 = vld [vmem:[#allocation2 + $0x4] sm:$0xf]  ;;  %v145_v20 = vld [vmem:[#allocation2 + $0x8] sm:$0x7]  ;;  %2598 = vmatpush3.bf16.msra.mxu1 %v2873_v57  ;;  %v3329_v57 = vld [vmem:[#allocation2 + $0xc] sm:$0x8] }
  0x55   :  { %v160_v21 = vrot.slane %v3234_v19, 7  ;;  %v163_v22 = vrot.slane %v145_v20, 7  ;;  %v3237_v25 = vld [vmem:[#allocation2 + $0x10] sm:$0xf]  ;;  %v148_v26 = vld [vmem:[#allocation2 + $0x14] sm:$0x7]  ;;  %2599 = vmatprep.subr.bf16.mxu1 %v2874_v62 }
  0x56   :  { %2542 = vmatpush3.bf16.msra.mxu0 %v2851_v4  ;;  %v167_v29 = vrot.slane %v3237_v25, 7  ;;  %v170_v33 = vrot.slane %v148_v26, 7  ;;  %v401_v36 = vshrl.u32 %v3234_v19, 16  ;;  %v423_v43 = vshrl.u32 %v3237_v25, 16  ;;  %v390_v44 = vld [vmem:[#allocation2 + $0x8] sm:$0xf] }
  0x57   :  { %2543 = vmatprep.subr.bf16.mxu0 %v2852_v12  ;;  %v161_v27 = vsel %vm3230_vm2, %v2194_v17, %v160_v21  ;;  %v162_v28 = vrot.slane %v160_v21, 4  ;;  %v404_v45 = vshll.u32 %v3234_v19, 16  ;;  %v3258_v47 = vld [vmem:[#allocation2 + $0x14] sm:$0xf]  ;;  %v410_v48 = vshrl.u32 %v390_v44, 16  ;;  %v2862_v4 = vld [vmem:[#allocation3 + $0xb0] sm:$0xff]  }
  0x58   :  { %v169_v32 = vrot.slane %v167_v29, 4  ;;  %v3247_v39 = vrot.slane %v401_v36, 7  ;;  %v168_v40 = vsel %vm3230_vm2, %v2195_v24, %v167_v29  ;;  %v413_v49 = vshll.u32 %v390_v44, 16  ;;  %2600 = vmatpush3.bf16.msra.mxu1 %v2874_v62  ;;  %v2868_v17 = vld [vmem:[#allocation3 + $0x60] sm:$0xff]   ;;  %v2870_v19 = vld [vmem:[#allocation3 + $0x70] sm:$0xff]   ;;  %v2871_v20 = vld [vmem:[#allocation3 + $0x78] sm:$0xff]  }
  0x59   :  { %v164_v31 = vsel %vm3230_vm2, %v162_v28, %v163_v22  ;;  %v3260_v50 = vrot.slane %v423_v43, 7  ;;  %v426_v51 = vshll.u32 %v3237_v25, 16  ;;  %v432_v54 = vshrl.u32 %v3258_v47, 16  ;;  %v2875_v25 = vld [vmem:[#allocation5 + $0x18] sm:$0xff]   ;;  %v2877_v28 = vld [vmem:[#allocation5 + $0x28] sm:$0xff]   ;;  %v2878_v29 = vld [vmem:[#allocation5 + $0x30] sm:$0xff]  }
  0x5a   :  { %2544 = vmatpush3.bf16.msra.mxu0 %v2852_v12  ;;  %v2196_v35 = vcombine.low %v161_v27, %v164_v31  ;;  %v171_v41 = vsel %vm3230_vm2, %v169_v32, %v170_v33  ;;  %v408_v46 = vrot.slane %v3247_v39, 4  ;;  %v435_v55 = vshll.u32 %v3258_v47, 16  ;;  %v2865_v12 = vld [vmem:[#allocation3 + $0x48] sm:$0xff]   ;;  %2601 = vmatprep.subr.bf16.mxu1 %v2875_v25  ;;  %v2876_v27 = vld [vmem:[#allocation5 + $0x20] sm:$0xff]   ;;  %v2890_v33 = vld [vmem:[%s3472_s5 + $0x8] sm:$0xff]  }
  0x5b   :  { %2545 = vmatprep.subr.bf16.mxu0 %v2853_v14  ;;  %v2197_v52 = vcombine.low %v168_v40, %v171_v41  ;;  %v412_v59 = vrot.slane %v410_v48, 7  ;;  %v430_v60 = vrot.slane %v3260_v50, 4  ;;  %v434_v61 = vrot.slane %v432_v54, 7  ;;  %v3295_v31 = vld [vmem:[#allocation5 + $0x80] sm:$0xff]   ;;  %v2888_v32 = vld [vmem:[%s3472_s5] sm:$0xff]   ;;  %v2954_v16 = vld [vmem:[%s3478_s11 + $0x10] sm:$0xff]  }
  0x5c   :  { %2551 = vmatprep.mubr.bf16.mxu0 %v2196_v35  ;;  %v406_v6 = vor.u32 %v404_v45, %v3247_v39  ;;  %v428_v21 = vor.u32 %v426_v51, %v3260_v50  ;;  %2602 = vmatpush3.bf16.msra.mxu1 %v2875_v25  ;;  %v2894_v35 = vld [vmem:[%s3472_s5 + $0x18] sm:$0xff]   ;;  %v2896_v36 = vld [vmem:[%s3472_s5 + $0x20] sm:$0xff]   ;;  %v2887_v25 = vld [vmem:[#allocation5 + $0xb8] sm:$0xff]  }
  0x5d   :  { %v415_v7 = vor.u32 %v413_v49, %v412_v59  ;;  %v437_v22 = vor.u32 %v435_v55, %v434_v61  ;;  %2603 = vmatprep.subr.bf16.mxu1 %v2876_v27  ;;  %v2902_v39 = vld [vmem:[%s3472_s5 + $0x38] sm:$0xff]   ;;  %v2226_v40 = vld [vmem:[%s3469_s2] ss:$0 sm:$0xff]  ;;  %v2231_v59 = vrot.slane %v617_v56, 11 }
  0x5e   :  { %2546 = vmatpush3.bf16.msra.mxu0 %v2853_v14  ;;  %v407_v9 = vsel %vm3271_vm5, %v3245_v37, %v406_v6  ;;  %v2866_v14 = vld [vmem:[#allocation3 + $0x50] sm:$0xff]   ;;  %v429_v23 = vsel %vm3271_vm5, %v3253_v42, %v428_v21 }
  0x5f   :  { %2547 = vmatprep.subr.bf16.mxu0 %v2854_v18  ;;  %v416_v10 = vsel %vm3271_vm5, %v408_v46, %v415_v7  ;;  %v438_v24 = vsel %vm3271_vm5, %v430_v60, %v437_v22  ;;  %v2898_v37 = vld [vmem:[%s3472_s5 + $0x28] sm:$0xff]  }
  0x60   :  { %v2216_v13 = vcombine.low %v407_v9, %v416_v10  ;;  %v2217_v26 = vcombine.low %v429_v23, %v438_v24  ;;  %2604 = vmatpush3.bf16.msra.mxu1 %v2876_v27  ;;  %v2886_v22 = vld [vmem:[#allocation5 + $0xb0] sm:$0xff]  }
  0x61   :  { %2605 = vmatprep.subr.bf16.mxu1 %v2877_v28 }
  0x62   :  { %2548 = vmatpush3.bf16.msra.mxu0 %v2854_v18  ;;  %v2869_v18 = vld [vmem:[#allocation3 + $0x68] sm:$0xff]  }
  0x63   :  { %2549 = vmatprep.subr.bf16.mxu0 %v2855_v34 }
  0x64   :  { %2606 = vmatpush3.bf16.msra.mxu1 %v2877_v28 }
  0x65   :  { %2607 = vmatprep.subr.bf16.mxu1 %v2878_v29 }
  0x66   :  { %2550 = vmatpush3.bf16.msra.mxu0 %v2855_v34  ;;  %v2892_v34 = vld [vmem:[%s3472_s5 + $0x10] sm:$0xff]  }
  0x67   :  { %2555 = vmatprep.subr.bf16.mxu0 %v2856_v38 }
  0x68   :  { %2608 = vmatpush3.bf16.msra.mxu1 %v2878_v29 }
  0x69   :  { %2552 = vmatmul.mubr.bf16.vlgmr.msra.gmra.mrb[0].mxu0 %v2197_v52  ;;  %2609 = vmatprep.subr.bf16.mxu1 %v2879_v30 }
  0x6a   :  { %2556 = vmatpush3.bf16.msra.mxu0 %v2856_v38  ;;  %2571 = vmatprep.mubr.bf16.mxu0 %v3267_v58  ;;  %v2900_v38 = vld [vmem:[%s3472_s5 + $0x30] sm:$0xff]  }
  0x6b   :  { %2557 = vmatprep.subr.bf16.mxu0 %v2857_v53 }
  0x6c   :  { %2610 = vmatpush3.bf16.msra.mxu1 %v2879_v30 }
  0x6d   :  { %2615 = vmatprep.subr.bf16.mxu1 %v3295_v31 }
  0x6e   :  { %2558 = vmatpush3.bf16.msra.mxu0 %v2857_v53 }
  0x6f   :  { %2559 = vmatprep.subr.bf16.mxu0 %v2858_v63 }
  0x72   :  { %2560 = vmatpush3.bf16.msra.mxu0 %v2858_v63 }
  0x73   :  { %2561 = vmatprep.subr.bf16.mxu0 %v2859_v0 }
  0x76   :  { %2562 = vmatpush3.bf16.msra.mxu0 %v2859_v0  ;;  %v2232_v0 = vrot.slane %v3329_v57, 11 }
  0x77   :  { %2563 = vmatprep.subr.bf16.mxu0 %v2860_v1 }
  0x7a   :  { %2564 = vmatpush3.bf16.msra.mxu0 %v2860_v1 }
  0x7b   :  { %2565 = vmatprep.subr.bf16.mxu0 %v2861_v2 }
  0x7e   :  { %2566 = vmatpush3.bf16.msra.mxu0 %v2861_v2 }
  0x7f   :  { %2567 = vmatprep.subr.bf16.mxu0 %v2862_v4 }
  0x82   :  { %2568 = vmatpush3.bf16.msra.mxu0 %v2862_v4 }
  0x83   :  { %2569 = vmatprep.subr.bf16.mxu0 %v2863_v5 }
  0x86   :  { %2570 = vmatpush3.bf16.msra.mxu0 %v2863_v5 }
  0x87   :  { %2575 = vmatprep.subr.bf16.mxu0 %v2864_v8 }
  0x89   :  { %2572 = vmatmul.mubr.bf16.vlgmr.msra.gmra.mrb[0].mxu0 %v3227_v11 }
  0x8a   :  { %2576 = vmatpush3.bf16.msra.mxu0 %v2864_v8  ;;  %2591 = vmatprep.mubr.bf16.mxu0 %v2216_v13 }
  0x8b   :  { %2577 = vmatprep.subr.bf16.mxu0 %v2865_v12 }
  0x8e   :  { %2578 = vmatpush3.bf16.msra.mxu0 %v2865_v12 }
  0x8f   :  { %2579 = vmatprep.subr.bf16.mxu0 %v2866_v14 }
  0x92   :  { %2580 = vmatpush3.bf16.msra.mxu0 %v2866_v14  ;;  %v2881_v14 = vld [vmem:[#allocation5 + $0x88] sm:$0xff]  }
  0x93   :  { %2581 = vmatprep.subr.bf16.mxu0 %v2867_v15 }
  0x96   :  { %2582 = vmatpush3.bf16.msra.mxu0 %v2867_v15  ;;  %v2882_v15 = vld [vmem:[#allocation5 + $0x90] sm:$0xff]  }
  0x97   :  { %2583 = vmatprep.subr.bf16.mxu0 %v2868_v17 }
  0x9a   :  { %2584 = vmatpush3.bf16.msra.mxu0 %v2868_v17  ;;  %v2883_v17 = vld [vmem:[#allocation5 + $0x98] sm:$0xff]  }
  0x9b   :  { %2585 = vmatprep.subr.bf16.mxu0 %v2869_v18 }
  0x9e   :  { %2586 = vmatpush3.bf16.msra.mxu0 %v2869_v18  ;;  %v2884_v18 = vld [vmem:[#allocation5 + $0xa0] sm:$0xff]  }
  0x9f   :  { %2587 = vmatprep.subr.bf16.mxu0 %v2870_v19 }
  0xa2   :  { %2588 = vmatpush3.bf16.msra.mxu0 %v2870_v19 }
  0xa3   :  { %2589 = vmatprep.subr.bf16.mxu0 %v2871_v20 }
  0xa6   :  { %2590 = vmatpush3.bf16.msra.mxu0 %v2871_v20  ;;  %v2885_v20 = vld [vmem:[#allocation5 + $0xa8] sm:$0xff]  }
  0xa7   :  { %2655 = vmatprep.subr.bf16.mxu0 %v2888_v32 }
  0xa9   :  { %2592 = vmatmul.mubr.bf16.vlgmr.msra.gmra.mrb[0].mxu0 %v2217_v26  ;;  %v864_v26 = vshrl.u32 %v617_v56, 16  ;;  %v2904_v56 = vld [vmem:[#allocation7] sm:$0xff]  }
  0xaa   :  { %2671 = vmatprep.mubr.bf16.mxu0 %v3267_v58  ;;  %2656 = vmatpush3.bf16.msra.mxu0 %v2888_v32  ;;  %v2889_v32 = vld [vmem:[#allocation5 + $0x40] sm:$0xff]  }
  0xab   :  { %2657 = vmatprep.subr.bf16.mxu0 %v2890_v33 }
  0xae   :  { %2658 = vmatpush3.bf16.msra.mxu0 %v2890_v33 }
  0xaf   :  { %2659 = vmatprep.subr.bf16.mxu0 %v2892_v34 }
  0xb2   :  { %2660 = vmatpush3.bf16.msra.mxu0 %v2892_v34 }
  0xb3   :  { %2661 = vmatprep.subr.bf16.mxu0 %v2894_v35 }
  0xb6   :  { %2662 = vmatpush3.bf16.msra.mxu0 %v2894_v35 }
  0xb7   :  { %2663 = vmatprep.subr.bf16.mxu0 %v2896_v36 }
  0xba   :  { %2664 = vmatpush3.bf16.msra.mxu0 %v2896_v36 }
  0xbb   :  { %2665 = vmatprep.subr.bf16.mxu0 %v2898_v37 }
  0xbe   :  { %2666 = vmatpush3.bf16.msra.mxu0 %v2898_v37  ;;  %v2891_v37 = vld [vmem:[#allocation5 + $0x48] sm:$0xff]  }
  0xbf   :  { %2667 = vmatprep.subr.bf16.mxu0 %v2900_v38 }
  0xc2   :  { %2668 = vmatpush3.bf16.msra.mxu0 %v2900_v38 }
  0xc3   :  { %2669 = vmatprep.subr.bf16.mxu0 %v2902_v39 }
  0xc6   :  { %2670 = vmatpush3.bf16.msra.mxu0 %v2902_v39  ;;  %v2893_v39 = vld [vmem:[#allocation5 + $0x50] sm:$0xff]  }
  0xc9   :  { %2672 = vmatmul.mubr.bf16.vlgmr.msra.gmra.mrb[4].mxu0 %v3227_v11 }
 0x17c   :  { %v2593_v41 = vpop.f32.mrb[0].mxu0 }
 0x17d   :  { %v574_v42 = vadd.f32 %v2593_v41, %v2226_v40  ;;  %v546_v43 = vpop.f32.mrb[1].mxu0  ;;  %v2897_v41 = vld [vmem:[#allocation5 + $0x60] sm:$0xff]  }
 0x17e   :  { %v572_v44 = vadd.f32 %v2226_v40, %v546_v43  ;;  %v2594_v45 = vpop.f32.mrb[2].mxu0  ;;  %v2899_v43 = vld [vmem:[#allocation5 + $0x68] sm:$0xff]  }
 0x17f   :  { %v575_v46 = vadd.f32 %v2594_v45, %v2226_v40  ;;  %v549_v47 = vpop.f32.mrb[3].mxu0  ;;  %v578_v50 = vmax.f32 %v574_v42, 0.0 }
 0x180   :  { %v576_v48 = vmax.f32 %v572_v44, 0.0  ;;  %v573_v49 = vadd.f32 %v2226_v40, %v549_v47  ;;  %v2895_v40 = vld [vmem:[#allocation5 + $0x58] sm:$0xff]   ;;  %v886_v47 = vshrl.u32 %v3329_v57, 16 }
 0x181   :  { %v579_v51 = vmax.f32 %v575_v46, 0.0  ;;  %v2901_v46 = vld [vmem:[#allocation5 + $0x70] sm:$0xff]  }
 0x182   :  { %v2360_v52 = vpack.c.bf16 %v576_v48, %v576_v48  ;;  %v577_v53 = vmax.f32 %v573_v49, 0.0 }
 0x183   :  { %v3326_v54 = vpack.c.bf16 %v579_v51, %v578_v50 }
 0x184   :  { %596 = vst [vmem:[#allocation2 + $0x4] sm:$0xf] %v2360_v52  ;;  %v580_v11 = vpack.c.bf16 %v577_v53, %v576_v48  ;;  %v2361_v55 = vpack.c.bf16 %v577_v53, %v577_v53  ;;  %v2903_v52 = vld [vmem:[#allocation5 + $0x78] sm:$0xff]   ;;  %v2252_v53 = vrot.slane %v886_v47, 11 }
 0x185   :  { %2393 = vst [vmem:[#allocation2 + $0x10] sm:$0xff] %v3326_v54  }
 0x186   :  { %597 = vst [vmem:[#allocation2 + $0x8] sm:$0xf] %v2361_v55 }
 0x18b   :  { %v618_v58 = vld [vmem:[#allocation2 + $0x4] sm:$0xf] }
 0x18c   :  { %v631_v60 = vrot.slane %v618_v58, 7  ;;  %v3331_v61 = vld [vmem:[#allocation2 + $0x10] sm:$0xf]  ;;  %v622_v62 = vld [vmem:[#allocation2 + $0x14] sm:$0x7]  ;;  %v869_v23 = vshrl.u32 %v618_v58, 16 }
 0x18d   :  { %v619_v63 = vld [vmem:[#allocation2 + $0x8] sm:$0x7]  ;;  %v638_v1 = vrot.slane %v3331_v61, 7  ;;  %v641_v6 = vrot.slane %v622_v62, 7  ;;  %v872_v29 = vshll.u32 %v618_v58, 16  ;;  %v891_v44 = vshrl.u32 %v3331_v61, 16 }
 0x18e   :  { %v633_v2 = vrot.slane %v631_v60, 4  ;;  %v634_v4 = vrot.slane %v619_v63, 7  ;;  %v632_v7 = vsel %vm3230_vm2, %v2231_v59, %v631_v60  ;;  %v861_v19 = vld [vmem:[#allocation2 + $0x8] sm:$0xf]  ;;  %v871_v27 = vrot.slane %v869_v23, 7  ;;  %v2905_v60 = vld [vmem:[#allocation7 + $0x8] sm:$0xff]  }
 0x18f   :  { %v640_v5 = vrot.slane %v638_v1, 4  ;;  %v639_v10 = vsel %vm3230_vm2, %v2232_v0, %v638_v1  ;;  %v878_v21 = vshrl.u32 %v861_v19, 16  ;;  %v881_v28 = vshll.u32 %v861_v19, 16  ;;  %v862_v42 = vld [vmem:[#allocation2 + $0x14] sm:$0xf]  ;;  %v2906_v0 = vld [vmem:[#allocation7 + $0x10] sm:$0xff]  }
 0x190   :  { %v635_v8 = vsel %vm3230_vm2, %v633_v2, %v634_v4  ;;  %v874_v33 = vor.u32 %v872_v29, %v871_v27  ;;  %v876_v34 = vrot.slane %v871_v27, 4  ;;  %v900_v45 = vshrl.u32 %v862_v42, 16  ;;  %v2907_v2 = vld [vmem:[#allocation7 + $0x18] sm:$0xff]   ;;  %v2909_v4 = vld [vmem:[#allocation7 + $0x28] sm:$0xff]  }
 0x191   :  { %v2233_v9 = vcombine.low %v632_v7, %v635_v8  ;;  %v642_v12 = vsel %vm3230_vm2, %v640_v5, %v641_v6  ;;  %v880_v24 = vrot.slane %v878_v21, 7  ;;  %v893_v48 = vrot.slane %v891_v44, 7  ;;  %v2910_v5 = vld [vmem:[#allocation7 + $0x30] sm:$0xff]   ;;  %v2911_v6 = vld [vmem:[#allocation7 + $0x38] sm:$0xff]   ;;  %v3356_v7 = vld [vmem:[#allocation7 + $0x80] sm:$0xff]  }
 0x192   :  { %v2234_v13 = vcombine.low %v639_v10, %v642_v12  ;;  %v902_v49 = vrot.slane %v900_v45, 7  ;;  %v894_v50 = vshll.u32 %v3331_v61, 16  ;;  %v903_v51 = vshll.u32 %v862_v42, 16  ;;  %v2928_v8 = vld [vmem:[#allocation8] sm:$0xff]   ;;  %v2930_v10 = vld [vmem:[#allocation8 + $0x10] sm:$0xff]  }
 0x193   :  { %2611 = vmatprep.mubr.bf16.mxu1 %v2233_v9  ;;  %v883_v30 = vor.u32 %v881_v28, %v880_v24  ;;  %v2929_v9 = vld [vmem:[#allocation8 + $0x8] sm:$0xff]   ;;  %2735 = vmatprep.subr.bf16.mxu0 %v2928_v8 }
 0x194   :  { %2612 = vmatmul.mubr.bf16.vlgmr.msra.gmra.mrb[0].mxu1 %v2234_v13  ;;  %v905_v55 = vor.u32 %v903_v51, %v902_v49  ;;  %2736 = vmatpush3.bf16.msra.mxu0 %v2928_v8  ;;  %v2264_v12 = vld [vmem:[%s3473_s6] ss:$0 sm:$0xff]  ;;  %v1213_v42 = vld [vmem:[#allocation2] sm:$0xc] }
 0x195   :  { %2616 = vmatpush3.bf16.msra.mxu1 %v3295_v31  ;;  %2631 = vmatprep.mubr.bf16.mxu1 %v580_v11  ;;  %v2251_v31 = vrot.slane %v864_v26, 11  ;;  %v884_v35 = vsel %vm3271_vm5, %v876_v34, %v883_v30  ;;  %v898_v11 = vrot.slane %v893_v48, 4  ;;  %v2263_v13 = vld [vmem:[%s3471_s4] ss:$0 sm:$0xff]  ;;  %v2277_v45 = vrot.slane %v1213_v42, 10  ;;  %v2936_v42 = vld [vmem:[#allocation8 + $0x80] sm:$0xff]  }
 0x196   :  { %2617 = vmatprep.subr.bf16.mxu1 %v2881_v14  ;;  %2737 = vmatprep.subr.bf16.mxu0 %v2929_v9  ;;  %v1460_v8 = vld [vmem:[#allocation2] sm:$0x8] }
 0x197   :  { %v875_v36 = vsel %vm3271_vm5, %v2251_v31, %v874_v33  ;;  %v906_v57 = vsel %vm3271_vm5, %v898_v11, %v905_v55 }
 0x198   :  { %v2253_v38 = vcombine.low %v875_v36, %v884_v35  ;;  %2738 = vmatpush3.bf16.msra.mxu0 %v2929_v9 }
 0x199   :  { %2618 = vmatpush3.bf16.msra.mxu1 %v2881_v14  ;;  %2739 = vmatprep.subr.bf16.mxu0 %v2930_v10 }
 0x19a   :  { %2619 = vmatprep.subr.bf16.mxu1 %v2882_v15 }
 0x19c   :  { %v2673_v61 = vpop.f32.mrb[4].mxu0  ;;  %2740 = vmatpush3.bf16.msra.mxu0 %v2930_v10 }
 0x19d   :  { %2620 = vmatpush3.bf16.msra.mxu1 %v2882_v15  ;;  %v1153_v62 = vpop.f32.mrb[5].mxu0  ;;  %v1162_v15 = vadd.f32 %v2673_v61, %v2264_v12 }
 0x19e   :  { %2621 = vmatprep.subr.bf16.mxu1 %v2883_v17  ;;  %v2674_v63 = vpop.f32.mrb[6].mxu0  ;;  %v1154_v19 = vadd.f32 %v2264_v12, %v1153_v62  ;;  %v2913_v62 = vld [vmem:[#allocation7 + $0x88] sm:$0xff]  }
 0x19f   :  { %v1156_v1 = vpop.f32.mrb[7].mxu0  ;;  %v1165_v28 = vadd.f32 %v2674_v63, %v2264_v12 }
 0x1a0   :  { %v1157_v31 = vadd.f32 %v2264_v12, %v1156_v1  ;;  %v2915_v1 = vld [vmem:[#allocation7 + $0x98] sm:$0xff]   ;;  %v2920_v12 = vld [vmem:[#allocation7 + $0x40] sm:$0xff]  }
 0x1a1   :  { %2622 = vmatpush3.bf16.msra.mxu1 %v2883_v17 }
 0x1a2   :  { %2623 = vmatprep.subr.bf16.mxu1 %v2884_v18 }
 0x1a5   :  { %2624 = vmatpush3.bf16.msra.mxu1 %v2884_v18 }
 0x1a6   :  { %2625 = vmatprep.subr.bf16.mxu1 %v2885_v20 }
 0x1a9   :  { %2626 = vmatpush3.bf16.msra.mxu1 %v2885_v20 }
 0x1aa   :  { %2627 = vmatprep.subr.bf16.mxu1 %v2886_v22 }
 0x1ad   :  { %2628 = vmatpush3.bf16.msra.mxu1 %v2886_v22 }
 0x1ae   :  { %2629 = vmatprep.subr.bf16.mxu1 %v2887_v25 }
 0x1b1   :  { %2630 = vmatpush3.bf16.msra.mxu1 %v2887_v25 }
 0x1b2   :  { %2635 = vmatprep.subr.bf16.mxu1 %v2889_v32 }
 0x1b4   :  { %2632 = vmatmul.mubr.bf16.vlgmr.msra.gmra.mrb[0].mxu1 %v3326_v54  ;;  %v896_v54 = vor.u32 %v894_v50, %v893_v48  ;;  %v2942_v50 = vld [vmem:[#allocation8 + $0xb0] sm:$0xff]  }
 0x1b5   :  { %2636 = vmatpush3.bf16.msra.mxu1 %v2889_v32  ;;  %2651 = vmatprep.mubr.bf16.mxu1 %v2253_v38 }
 0x1b6   :  { %2637 = vmatprep.subr.bf16.mxu1 %v2891_v37  ;;  %v897_v58 = vsel %vm3271_vm5, %v2252_v53, %v896_v54 }
 0x1b7   :  { %v2254_v59 = vcombine.low %v897_v58, %v906_v57 }
 0x1b9   :  { %2638 = vmatpush3.bf16.msra.mxu1 %v2891_v37 }
 0x1ba   :  { %2639 = vmatprep.subr.bf16.mxu1 %v2893_v39 }
 0x1bd   :  { %2640 = vmatpush3.bf16.msra.mxu1 %v2893_v39 }
 0x1be   :  { %2641 = vmatprep.subr.bf16.mxu1 %v2895_v40 }
 0x1c1   :  { %2642 = vmatpush3.bf16.msra.mxu1 %v2895_v40 }
 0x1c2   :  { %2643 = vmatprep.subr.bf16.mxu1 %v2897_v41 }
 0x1c5   :  { %2644 = vmatpush3.bf16.msra.mxu1 %v2897_v41 }
 0x1c6   :  { %2645 = vmatprep.subr.bf16.mxu1 %v2899_v43 }
 0x1c9   :  { %2646 = vmatpush3.bf16.msra.mxu1 %v2899_v43  ;;  %v1216_v43 = vld [vmem:[#allocation2 + $0xc] sm:$0xc] }
 0x1ca   :  { %2647 = vmatprep.subr.bf16.mxu1 %v2901_v46  ;;  %v2278_v51 = vrot.slane %v1216_v43, 10  ;;  %v2309_v43 = vld [vmem:[%s3475_s8] ss:$0 sm:$0xff] }
 0x1cd   :  { %2648 = vmatpush3.bf16.msra.mxu1 %v2901_v46 }
 0x1ce   :  { %2649 = vmatprep.subr.bf16.mxu1 %v2903_v52 }
 0x1d1   :  { %2650 = vmatpush3.bf16.msra.mxu1 %v2903_v52 }
 0x1d2   :  { %2675 = vmatprep.subr.bf16.mxu1 %v2904_v56 }
 0x1d4   :  { %2652 = vmatmul.mubr.bf16.vlgmr.msra.gmra.mrb[0].mxu1 %v2254_v59 }
 0x1d5   :  { %2676 = vmatpush3.bf16.msra.mxu1 %v2904_v56 }
 0x1d6   :  { %2677 = vmatprep.subr.bf16.mxu1 %v2905_v60 }
 0x1d9   :  { %2678 = vmatpush3.bf16.msra.mxu1 %v2905_v60 }
 0x1da   :  { %2679 = vmatprep.subr.bf16.mxu1 %v2906_v0 }
 0x1dd   :  { %2680 = vmatpush3.bf16.msra.mxu1 %v2906_v0  ;;  %v2914_v0 = vld [vmem:[#allocation7 + $0x90] sm:$0xff]  }
 0x1de   :  { %2681 = vmatprep.subr.bf16.mxu1 %v2907_v2 }
 0x1e1   :  { %2682 = vmatpush3.bf16.msra.mxu1 %v2907_v2  ;;  %v2916_v2 = vld [vmem:[#allocation7 + $0xa0] sm:$0xff]  }
 0x1e2   :  { %2683 = vmatprep.subr.bf16.mxu1 %v2908_v3 }
 0x1e5   :  { %2684 = vmatpush3.bf16.msra.mxu1 %v2908_v3  ;;  %v2917_v3 = vld [vmem:[#allocation7 + $0xa8] sm:$0xff]  }
 0x1e6   :  { %2685 = vmatprep.subr.bf16.mxu1 %v2909_v4 }
 0x1e9   :  { %2686 = vmatpush3.bf16.msra.mxu1 %v2909_v4  ;;  %v2918_v4 = vld [vmem:[#allocation7 + $0xb0] sm:$0xff]  }
 0x1ea   :  { %2687 = vmatprep.subr.bf16.mxu1 %v2910_v5 }
 0x1ed   :  { %2688 = vmatpush3.bf16.msra.mxu1 %v2910_v5 }
 0x1ee   :  { %2689 = vmatprep.subr.bf16.mxu1 %v2911_v6 }
 0x1f1   :  { %2690 = vmatpush3.bf16.msra.mxu1 %v2911_v6 }
 0x1f2   :  { %2695 = vmatprep.subr.bf16.mxu1 %v3356_v7 }
 0x2a7   :  { %v2653_v14 = vpop.f32.mrb[0].mxu1 }
 0x2a8   :  { %v1042_v17 = vadd.f32 %v2653_v14, %v2263_v13  ;;  %v1014_v18 = vpop.f32.mrb[1].mxu1 }
 0x2a9   :  { %v1040_v20 = vadd.f32 %v2263_v13, %v1014_v18  ;;  %v2654_v21 = vpop.f32.mrb[2].mxu1 }
 0x2aa   :  { %v1046_v22 = vmax.f32 %v1042_v17, 0.0  ;;  %v1043_v23 = vadd.f32 %v2654_v21, %v2263_v13  ;;  %v1017_v24 = vpop.f32.mrb[3].mxu1  ;;  %v2921_v17 = vld [vmem:[#allocation7 + $0x48] sm:$0xff]   ;;  %v2924_v21 = vld [vmem:[#allocation7 + $0x60] sm:$0xff]  }
 0x2ab   :  { %v1044_v26 = vmax.f32 %v1040_v20, 0.0  ;;  %v1041_v25 = vadd.f32 %v2263_v13, %v1017_v24  ;;  %v2297_v13 = vrot.slane %v1460_v8, 11  ;;  %v2923_v20 = vld [vmem:[#allocation7 + $0x58] sm:$0xff]  }
 0x2ac   :  { %v1170_v27 = vadd.f32 %v1162_v15, %v1046_v22  ;;  %v1047_v29 = vmax.f32 %v1043_v23, 0.0  ;;  %v2925_v22 = vld [vmem:[#allocation7 + $0x68] sm:$0xff]   ;;  %v2926_v23 = vld [vmem:[#allocation7 + $0x70] sm:$0xff]  }
 0x2ad   :  { %v1168_v30 = vadd.f32 %v1154_v19, %v1044_v26  ;;  %v1045_v32 = vmax.f32 %v1041_v25, 0.0  ;;  %v2922_v19 = vld [vmem:[#allocation7 + $0x50] sm:$0xff]   ;;  %v2927_v26 = vld [vmem:[#allocation7 + $0x78] sm:$0xff]  }
 0x2ae   :  { %v3365_v33 = vadd.f32 %v1165_v28, %v1047_v29  ;;  %v1174_v36 = vmax.f32 %v1170_v27, 0.0  ;;  %v1462_v25 = vld [vmem:[#allocation2 + $0xc] sm:$0x8] }
 0x2af   :  { %v1172_v34 = vmax.f32 %v1168_v30, 0.0  ;;  %v1169_v35 = vadd.f32 %v1157_v31, %v1045_v32  ;;  %v2298_v29 = vrot.slane %v1462_v25, 11  ;;  %v1900_v25 = vld [vmem:[#allocation2] sm:$0x8] }
 0x2b0   :  { %v1175_v37 = vmax.f32 %v3365_v33, 0.0 }
 0x2b1   :  { %v2364_v38 = vpack.c.bf16 %v1172_v34, %v1172_v34  ;;  %v3368_v39 = vmax.f32 %v1169_v35, 0.0  ;;  %v2931_v35 = vld [vmem:[#allocation8 + $0x18] sm:$0xff]  }
 0x2b2   :  { %v3372_v40 = vpack.c.bf16 %v1175_v37, %v1174_v36  ;;  %2741 = vmatprep.subr.bf16.mxu0 %v2931_v35  ;;  %v2932_v36 = vld [vmem:[#allocation8 + $0x20] sm:$0xff]  }
 0x2b3   :  { %1192 = vst [vmem:[#allocation2 + $0x4] sm:$0xf] %v2364_v38  ;;  %v2365_v41 = vpack.c.bf16 %v3368_v39, %v3368_v39  ;;  %v1176_v63 = vpack.c.bf16 %v3368_v39, %v1172_v34  ;;  %2742 = vmatpush3.bf16.msra.mxu0 %v2931_v35  ;;  %v2933_v38 = vld [vmem:[#allocation8 + $0x28] sm:$0xff]  }
 0x2b4   :  { %2394 = vst [vmem:[#allocation2 + $0x10] sm:$0xff] %v3372_v40   ;;  %2743 = vmatprep.subr.bf16.mxu0 %v2932_v36 }
 0x2b5   :  { %1193 = vst [vmem:[#allocation2 + $0x8] sm:$0xf] %v2365_v41  ;;  %v2935_v41 = vld [vmem:[#allocation8 + $0x38] sm:$0xff]  }
 0x2b7   :  { %2744 = vmatpush3.bf16.msra.mxu0 %v2932_v36  ;;  %v2946_v36 = vld [vmem:[#allocation8 + $0x50] sm:$0xff]  }
 0x2b8   :  { %2745 = vmatprep.subr.bf16.mxu0 %v2933_v38 }
 0x2ba   :  { %v1214_v44 = vld [vmem:[#allocation2 + $0x4] sm:$0xf] }
 0x2bb   :  { %v1230_v46 = vrot.slane %v1214_v44, 6  ;;  %v3377_v47 = vld [vmem:[#allocation2 + $0x10] sm:$0xf]  ;;  %v1218_v48 = vld [vmem:[#allocation2 + $0x14] sm:$0x3]  ;;  %v1470_v5 = vrot.slane %v1214_v44, 7  ;;  %2746 = vmatpush3.bf16.msra.mxu0 %v2933_v38 }
 0x2bc   :  { %v1215_v49 = vld [vmem:[#allocation2 + $0x8] sm:$0x3]  ;;  %v1237_v52 = vrot.slane %v3377_v47, 6  ;;  %v1240_v55 = vrot.slane %v1218_v48, 6  ;;  %v1477_v24 = vrot.slane %v3377_v47, 7  ;;  %v2947_v38 = vld [vmem:[#allocation8 + $0x58] sm:$0xff]  }
 0x2bd   :  { %v1232_v53 = vrot.slane %v1230_v46, 4  ;;  %v1233_v54 = vrot.slane %v1215_v49, 6  ;;  %v1231_v56 = vsel %vm3379_vm8, %v2277_v45, %v1230_v46  ;;  %v1461_v6 = vld [vmem:[#allocation2 + $0x8] sm:$0x7]  ;;  %v1472_v9 = vrot.slane %v1470_v5, 4 }
 0x2be   :  { %v1239_v11 = vrot.slane %v1237_v52, 4  ;;  %v1238_v59 = vsel %vm3379_vm8, %v2278_v51, %v1237_v52  ;;  %v1473_v10 = vrot.slane %v1461_v6, 7  ;;  %v1471_v15 = vsel %vm3230_vm2, %v2297_v13, %v1470_v5  ;;  %v1463_v27 = vld [vmem:[#allocation2 + $0x14] sm:$0x7] }
 0x2bf   :  { %v1234_v58 = vsel %vm3379_vm8, %v1232_v53, %v1233_v54  ;;  %v1479_v28 = vrot.slane %v1477_v24, 4  ;;  %v1480_v30 = vrot.slane %v1463_v27, 7  ;;  %v1478_v32 = vsel %vm3230_vm2, %v2298_v29, %v1477_v24  ;;  %v2944_v29 = vld [vmem:[#allocation8 + $0x40] sm:$0xff]  }
 0x2c0   :  { %v2279_v57 = vcombine.low %v1231_v56, %v1234_v58  ;;  %v1241_v60 = vsel %vm3379_vm8, %v1239_v11, %v1240_v55  ;;  %v1474_v14 = vsel %vm3230_vm2, %v1472_v9, %v1473_v10 }
 0x2c1   :  { %v2280_v61 = vcombine.low %v1238_v59, %v1241_v60  ;;  %v2299_v18 = vcombine.low %v1471_v15, %v1474_v14  ;;  %v1481_v31 = vsel %vm3230_vm2, %v1479_v28, %v1480_v30  ;;  %v1660_v60 = vld [vmem:[#allocation2] sm:$0xc]  ;;  %v2334_v30 = vrot.slane %v1900_v25, 11 }
 0x2c2   :  { %2691 = vmatprep.mubr.bf16.mxu1 %v2279_v57  ;;  %v2300_v34 = vcombine.low %v1478_v32, %v1481_v31 }
 0x2c3   :  { %2692 = vmatmul.mubr.bf16.vlgmr.msra.gmra.mrb[4].mxu1 %v2280_v61  ;;  %v1663_v61 = vld [vmem:[#allocation2 + $0xc] sm:$0xc] }
 0x2c4   :  { %2696 = vmatpush3.bf16.msra.mxu1 %v3356_v7  ;;  %2711 = vmatprep.mubr.bf16.mxu1 %v1176_v63  ;;  %v2919_v7 = vld [vmem:[#allocation7 + $0xb8] sm:$0xff]   ;;  %v2314_v63 = vrot.slane %v1660_v60, 10  ;;  %v2959_v60 = vld [vmem:[%s3478_s11 + $0x38] sm:$0xff]  }
 0x2c5   :  { %2697 = vmatprep.subr.bf16.mxu1 %v2913_v62 }
 0x2c8   :  { %2698 = vmatpush3.bf16.msra.mxu1 %v2913_v62 }
 0x2c9   :  { %2699 = vmatprep.subr.bf16.mxu1 %v2914_v0 }
 0x2cc   :  { %2700 = vmatpush3.bf16.msra.mxu1 %v2914_v0 }
 0x2cd   :  { %2701 = vmatprep.subr.bf16.mxu1 %v2915_v1 }
 0x2d0   :  { %2702 = vmatpush3.bf16.msra.mxu1 %v2915_v1 }
 0x2d1   :  { %2703 = vmatprep.subr.bf16.mxu1 %v2916_v2 }
 0x2d4   :  { %2704 = vmatpush3.bf16.msra.mxu1 %v2916_v2 }
 0x2d5   :  { %2705 = vmatprep.subr.bf16.mxu1 %v2917_v3 }
 0x2d8   :  { %2706 = vmatpush3.bf16.msra.mxu1 %v2917_v3 }
 0x2d9   :  { %2707 = vmatprep.subr.bf16.mxu1 %v2918_v4 }
 0x2dc   :  { %2708 = vmatpush3.bf16.msra.mxu1 %v2918_v4  ;;  %v2315_v4 = vrot.slane %v1663_v61, 10 }
 0x2dd   :  { %2709 = vmatprep.subr.bf16.mxu1 %v2919_v7 }
 0x2e0   :  { %2710 = vmatpush3.bf16.msra.mxu1 %v2919_v7 }
 0x2e1   :  { %2715 = vmatprep.subr.bf16.mxu1 %v2920_v12 }
 0x2e3   :  { %2712 = vmatmul.mubr.bf16.vlgmr.msra.gmra.mrb[4].mxu1 %v3372_v40  ;;  %v2934_v40 = vld [vmem:[#allocation8 + $0x30] sm:$0xff]  }
 0x2e4   :  { %2716 = vmatpush3.bf16.msra.mxu1 %v2920_v12  ;;  %2731 = vmatprep.mubr.bf16.mxu1 %v2299_v18  ;;  %v2937_v18 = vld [vmem:[#allocation8 + $0x88] sm:$0xff]  }
 0x2e5   :  { %2717 = vmatprep.subr.bf16.mxu1 %v2921_v17  ;;  %2747 = vmatprep.subr.bf16.mxu0 %v2934_v40 }
 0x2e6   :  { %2748 = vmatpush3.bf16.msra.mxu0 %v2934_v40  ;;  %v2948_v40 = vld [vmem:[#allocation8 + $0x60] sm:$0xff]  }
 0x2e7   :  { %2749 = vmatprep.subr.bf16.mxu0 %v2935_v41 }
 0x2e8   :  { %2718 = vmatpush3.bf16.msra.mxu1 %v2921_v17 }
 0x2e9   :  { %2719 = vmatprep.subr.bf16.mxu1 %v2922_v19 }
 0x2ea   :  { %2750 = vmatpush3.bf16.msra.mxu0 %v2935_v41  ;;  %v2949_v41 = vld [vmem:[#allocation8 + $0x68] sm:$0xff]  }
 0x2eb   :  { %2755 = vmatprep.subr.bf16.mxu0 %v2936_v42 }
 0x2ec   :  { %2720 = vmatpush3.bf16.msra.mxu1 %v2922_v19  ;;  %v2938_v19 = vld [vmem:[#allocation8 + $0x90] sm:$0xff]  }
 0x2ed   :  { %2721 = vmatprep.subr.bf16.mxu1 %v2923_v20 }
 0x2f0   :  { %2722 = vmatpush3.bf16.msra.mxu1 %v2923_v20  ;;  %v2939_v20 = vld [vmem:[#allocation8 + $0x98] sm:$0xff]  }
 0x2f1   :  { %2723 = vmatprep.subr.bf16.mxu1 %v2924_v21 }
 0x2f4   :  { %2724 = vmatpush3.bf16.msra.mxu1 %v2924_v21  ;;  %v2940_v21 = vld [vmem:[#allocation8 + $0xa0] sm:$0xff]  }
 0x2f5   :  { %2725 = vmatprep.subr.bf16.mxu1 %v2925_v22 }
 0x2f8   :  { %2726 = vmatpush3.bf16.msra.mxu1 %v2925_v22  ;;  %v2941_v22 = vld [vmem:[#allocation8 + $0xa8] sm:$0xff]  }
 0x2f9   :  { %2727 = vmatprep.subr.bf16.mxu1 %v2926_v23 }
 0x2fc   :  { %2728 = vmatpush3.bf16.msra.mxu1 %v2926_v23 }
 0x2fd   :  { %2729 = vmatprep.subr.bf16.mxu1 %v2927_v26 }
 0x300   :  { %2730 = vmatpush3.bf16.msra.mxu1 %v2927_v26  ;;  %v2943_v26 = vld [vmem:[#allocation8 + $0xb8] sm:$0xff]  }
 0x303   :  { %2732 = vmatmul.mubr.bf16.vlgmr.msra.gmra.mrb[4].mxu1 %v2300_v34  ;;  %v2945_v34 = vld [vmem:[#allocation8 + $0x48] sm:$0xff]  }
 0x3d6   :  { %v2733_v44 = vpop.f32.mrb[4].mxu1 }
 0x3d7   :  { %v1617_v45 = vadd.f32 %v2733_v44, %v2309_v43  ;;  %v1589_v46 = vpop.f32.mrb[5].mxu1  ;;  %v2951_v44 = vld [vmem:[#allocation8 + $0x78] sm:$0xff]  }
 0x3d8   :  { %v1615_v47 = vadd.f32 %v2309_v43, %v1589_v46  ;;  %v2734_v48 = vpop.f32.mrb[6].mxu1 }
 0x3d9   :  { %v1618_v49 = vadd.f32 %v2734_v48, %v2309_v43  ;;  %v1592_v51 = vpop.f32.mrb[7].mxu1  ;;  %v1621_v54 = vmax.f32 %v1617_v45, 0.0  ;;  %v1902_v45 = vld [vmem:[#allocation2 + $0xc] sm:$0x8] }
 0x3da   :  { %v1619_v52 = vmax.f32 %v1615_v47, 0.0  ;;  %v1616_v53 = vadd.f32 %v2309_v43, %v1592_v51  ;;  %v2335_v48 = vrot.slane %v1902_v45, 11 }
 0x3db   :  { %v1622_v11 = vmax.f32 %v1618_v49, 0.0 }
 0x3dc   :  { %v2368_v55 = vpack.c.bf16 %v1619_v52, %v1619_v52  ;;  %v1620_v56 = vmax.f32 %v1616_v53, 0.0 }
 0x3dd   :  { %v3407_v58 = vpack.c.bf16 %v1622_v11, %v1621_v54  ;;  %v2952_v54 = vld [vmem:[%s3478_s11] sm:$0xff]   ;;  %v3061_v11 = vmov 0.0  }
 0x3de   :  { %1639 = vst [vmem:[#allocation2 + $0x4] sm:$0xf] %v2368_v55  ;;  %v1623_v57 = vpack.c.bf16 %v1620_v56, %v1619_v52  ;;  %v2369_v59 = vpack.c.bf16 %v1620_v56, %v1620_v56  ;;  %2795 = vmatprep.subr.bf16.mxu1 %v3061_v11  ;;  %v2953_v55 = vld [vmem:[%s3478_s11 + $0x8] sm:$0xff]   ;;  %v2955_v56 = vld [vmem:[%s3478_s11 + $0x18] sm:$0xff]   ;;  %2811 = vmatprep.mubr.msk.bf16.mxu1 %vm3062_vm9, %v3061_v11 }
 0x3df   :  { %2395 = vst [vmem:[#allocation2 + $0x10] sm:$0xff] %v3407_v58   ;;  %2796 = vmatpush3.bf16.msra.mxu1 %v2952_v54 }
 0x3e0   :  { %1640 = vst [vmem:[#allocation2 + $0x8] sm:$0xf] %v2369_v59  ;;  %2797 = vmatprep.subr.bf16.mxu1 %v3061_v11  ;;  %v2958_v59 = vld [vmem:[%s3478_s11 + $0x30] sm:$0xff]  }
 0x3e3   :  { %2798 = vmatpush3.bf16.msra.mxu1 %v2953_v55 }
 0x3e4   :  { %2799 = vmatprep.subr.bf16.mxu1 %v3061_v11 }
 0x3e5   :  { %v1661_v62 = vld [vmem:[#allocation2 + $0x4] sm:$0xf] }
 0x3e6   :  { %v1674_v0 = vrot.slane %v1661_v62, 6  ;;  %v3410_v1 = vld [vmem:[#allocation2 + $0x10] sm:$0xf]  ;;  %v1665_v2 = vld [vmem:[#allocation2 + $0x14] sm:$0x3]  ;;  %v1910_v23 = vrot.slane %v1661_v62, 7 }
 0x3e7   :  { %v1662_v3 = vld [vmem:[#allocation2 + $0x8] sm:$0x3]  ;;  %v1681_v5 = vrot.slane %v3410_v1, 6  ;;  %v1684_v9 = vrot.slane %v1665_v2, 6  ;;  %v1917_v43 = vrot.slane %v3410_v1, 7  ;;  %2800 = vmatpush3.bf16.msra.mxu1 %v2954_v16 }
 0x3e8   :  { %v1676_v6 = vrot.slane %v1674_v0, 4  ;;  %v1677_v7 = vrot.slane %v1662_v3, 6  ;;  %v1675_v10 = vsel %vm3379_vm8, %v2314_v63, %v1674_v0  ;;  %v1901_v24 = vld [vmem:[#allocation2 + $0x8] sm:$0x7]  ;;  %v1912_v27 = vrot.slane %v1910_v23, 4  ;;  %2801 = vmatprep.subr.bf16.mxu1 %v3061_v11 }
 0x3e9   :  { %v1683_v8 = vrot.slane %v1681_v5, 4  ;;  %v1682_v14 = vsel %vm3379_vm8, %v2315_v4, %v1681_v5  ;;  %v1913_v28 = vrot.slane %v1901_v24, 7  ;;  %v1911_v32 = vsel %vm3230_vm2, %v2334_v30, %v1910_v23  ;;  %v1903_v46 = vld [vmem:[#allocation2 + $0x14] sm:$0x7] }
 0x3ea   :  { %v1678_v12 = vsel %vm3379_vm8, %v1676_v6, %v1677_v7  ;;  %v1919_v47 = vrot.slane %v1917_v43, 4  ;;  %v1920_v49 = vrot.slane %v1903_v46, 7  ;;  %v1918_v52 = vsel %vm3230_vm2, %v2335_v48, %v1917_v43 }
 0x3eb   :  { %v2316_v13 = vcombine.low %v1675_v10, %v1678_v12  ;;  %v1685_v15 = vsel %vm3379_vm8, %v1683_v8, %v1684_v9  ;;  %v1914_v31 = vsel %vm3230_vm2, %v1912_v27, %v1913_v28  ;;  %2802 = vmatpush3.bf16.msra.mxu1 %v2955_v56  ;;  %v2346_v10 = vld [vmem:[%s3477_s10] ss:$0 sm:$0xff] }
 0x3ec   :  { %v2317_v17 = vcombine.low %v1682_v14, %v1685_v15  ;;  %v2336_v35 = vcombine.low %v1911_v32, %v1914_v31  ;;  %v1921_v51 = vsel %vm3230_vm2, %v1919_v47, %v1920_v49  ;;  %2803 = vmatprep.subr.bf16.mxu1 %v3061_v11  ;;  %v2347_v31 = vld [vmem:[%s3479_s12] ss:$0 sm:$0xff] }
 0x3ed   :  { %2751 = vmatprep.mubr.bf16.mxu0 %v2316_v13  ;;  %v2337_v53 = vcombine.low %v1918_v52, %v1921_v51 }
 0x3ee   :  { %2752 = vmatmul.mubr.bf16.vlgmr.msra.gmra.mrb[8].mxu0 %v2317_v17 }
 0x3ef   :  { %2756 = vmatpush3.bf16.msra.mxu0 %v2936_v42  ;;  %2771 = vmatprep.mubr.bf16.mxu0 %v1623_v57  ;;  %v2950_v42 = vld [vmem:[#allocation8 + $0x70] sm:$0xff]  }
 0x3f0   :  { %2757 = vmatprep.subr.bf16.mxu0 %v2937_v18  ;;  %v2957_v57 = vld [vmem:[%s3478_s11 + $0x28] sm:$0xff]  }
 0x3f3   :  { %2758 = vmatpush3.bf16.msra.mxu0 %v2937_v18 }
 0x3f4   :  { %2759 = vmatprep.subr.bf16.mxu0 %v2938_v19 }
 0x3f7   :  { %2760 = vmatpush3.bf16.msra.mxu0 %v2938_v19 }
 0x3f8   :  { %2761 = vmatprep.subr.bf16.mxu0 %v2939_v20 }
 0x3fb   :  { %2762 = vmatpush3.bf16.msra.mxu0 %v2939_v20 }
 0x3fc   :  { %2763 = vmatprep.subr.bf16.mxu0 %v2940_v21 }
 0x3ff   :  { %2764 = vmatpush3.bf16.msra.mxu0 %v2940_v21 }
 0x400   :  { %2765 = vmatprep.subr.bf16.mxu0 %v2941_v22 }
 0x403   :  { %2766 = vmatpush3.bf16.msra.mxu0 %v2941_v22 }
 0x404   :  { %2767 = vmatprep.subr.bf16.mxu0 %v2942_v50 }
 0x407   :  { %2768 = vmatpush3.bf16.msra.mxu0 %v2942_v50 }
 0x408   :  { %2769 = vmatprep.subr.bf16.mxu0 %v2943_v26 }
 0x40b   :  { %2770 = vmatpush3.bf16.msra.mxu0 %v2943_v26 }
 0x40c   :  { %2775 = vmatprep.subr.bf16.mxu0 %v2944_v29 }
 0x40e   :  { %2772 = vmatmul.mubr.bf16.vlgmr.msra.gmra.mrb[12].mxu0 %v3407_v58  ;;  %v2956_v58 = vld [vmem:[%s3478_s11 + $0x20] sm:$0xff]  }
 0x40f   :  { %2776 = vmatpush3.bf16.msra.mxu0 %v2944_v29  ;;  %2791 = vmatprep.mubr.bf16.mxu0 %v2336_v35 }
 0x410   :  { %2777 = vmatprep.subr.bf16.mxu0 %v2945_v34  ;;  %2804 = vmatpush3.bf16.msra.mxu1 %v2956_v58 }
 0x411   :  { %2805 = vmatprep.subr.bf16.mxu1 %v3061_v11 }
 0x413   :  { %2778 = vmatpush3.bf16.msra.mxu0 %v2945_v34 }
 0x414   :  { %2779 = vmatprep.subr.bf16.mxu0 %v2946_v36  ;;  %2806 = vmatpush3.bf16.msra.mxu1 %v2957_v57 }
 0x415   :  { %2807 = vmatprep.subr.bf16.mxu1 %v3061_v11 }
 0x417   :  { %2780 = vmatpush3.bf16.msra.mxu0 %v2946_v36 }
 0x418   :  { %2781 = vmatprep.subr.bf16.mxu0 %v2947_v38  ;;  %2808 = vmatpush3.bf16.msra.mxu1 %v2958_v59 }
 0x419   :  { %2809 = vmatprep.subr.bf16.mxu1 %v3061_v11 }
 0x41b   :  { %2782 = vmatpush3.bf16.msra.mxu0 %v2947_v38 }
 0x41c   :  { %2783 = vmatprep.subr.bf16.mxu0 %v2948_v40  ;;  %2810 = vmatpush3.bf16.msra.mxu1 %v2959_v60 }
 0x41f   :  { %2784 = vmatpush3.bf16.msra.mxu0 %v2948_v40 }
 0x420   :  { %2785 = vmatprep.subr.bf16.mxu0 %v2949_v41 }
 0x423   :  { %2786 = vmatpush3.bf16.msra.mxu0 %v2949_v41 }
 0x424   :  { %2787 = vmatprep.subr.bf16.mxu0 %v2950_v42 }
 0x427   :  { %2788 = vmatpush3.bf16.msra.mxu0 %v2950_v42 }
 0x428   :  { %2789 = vmatprep.subr.bf16.mxu0 %v2951_v44 }
 0x42b   :  { %2790 = vmatpush3.bf16.msra.mxu0 %v2951_v44 }
 0x42e   :  { %2792 = vmatmul.mubr.bf16.vlgmr.msra.gmra.mrb[16].mxu0 %v2337_v53 }
 0x4c1   :  { %v2753_v61 = vpop.f32.mrb[8].mxu0 }
 0x4c2   :  { %v1792_v62 = vpop.f32.mrb[9].mxu0 }
 0x4c3   :  { %v2754_v63 = vpop.f32.mrb[10].mxu0 }
 0x4c4   :  { %v1794_v0 = vpop.f32.mrb[11].mxu0 }
 0x4e1   :  { %v2773_v1 = vpop.f32.mrb[12].mxu0 }
 0x4e2   :  { %v1887_v2 = vpop.f32.mrb[13].mxu0 }
 0x4e3   :  { %v2774_v3 = vpop.f32.mrb[14].mxu0 }
 0x4e4   :  { %v1897_v4 = vadd.f32 %v2774_v3, %v2754_v63  ;;  %v1889_v5 = vpop.f32.mrb[15].mxu0 }
 0x4e5   :  { %v1890_v6 = vadd.f32 %v1889_v5, %v1794_v0 }
 0x501   :  { %v2793_v7 = vpop.f32.mrb[16].mxu0 }
 0x502   :  { %v2029_v8 = vpop.f32.mrb[17].mxu0 }
 0x503   :  { %v2794_v9 = vpop.f32.mrb[18].mxu0 }
 0x504   :  { %v2043_v12 = vadd.f32 %v2794_v9, %v1897_v4  ;;  %v2031_v13 = vpop.f32.mrb[19].mxu0 }
 0x505   :  { %v2042_v14 = vadd.f32 %v2031_v13, %v1890_v6 }
 0x506   :  { %v2052_v15 = vadd.f32 %v2346_v10, %v2043_v12 }
 0x507   :  { %v2051_v17 = vadd.f32 %v2346_v10, %v2042_v14 }
 0x508   :  { %v2054_v18 = vmax.f32 %v2052_v15, 0.0 }
 0x509   :  { %v2053_v19 = vmax.f32 %v2051_v17, 0.0 }
 0x50a   :  { %v2056_v20 = vadd.f32 %v2054_v18, %v1175_v37 }
 0x50b   :  { %v2055_v21 = vadd.f32 %v2053_v19, %v3368_v39 }
 0x50c   :  { %v2058_v22 = vmax.f32 %v2056_v20, 0.0 }
 0x50d   :  { %v2057_v50 = vmax.f32 %v2055_v21, 0.0 }
 0x50e   :  { %v2060_v23 = vpack.c.bf16 %v2058_v22, %v2058_v22 }
 0x50f   :  { %v2059_v24 = vpack.c.bf16 %v2057_v50, %v2057_v50 }
 0x510   :  { %v2087_v26 = vunpack.c.l.b16 %v2060_v23 }
 0x511   :  { %v2086_v25 = vunpack.c.l.b16 %v2059_v24 }
 0x512   :  { %v2089_v27 = vrot.slane %v2087_v26, 6 }
 0x513   :  { %v2088_v28 = vrot.slane %v2086_v25, 7 }
 0x515   :  { %v2091_v29 = vsel %vm2090_vm10, %v2089_v27, %v2088_v28 }
 0x516   :  { %v2092_v30 = vpack.c.b16 %v2091_v29, %v2091_v29 }
 0x518   :  { %2812 = vmatmul.mubr.bf16.vlgmr.msra.gmra.mrb[8].mxu1 %v2092_v30 }
 0x5eb   :  { %v2176_v33 = vpop.f32.mrb[8].mxu1 }
 0x5ec   :  { %v2177_v37 = vadd.f32 %v2347_v31, %v2176_v33  ;;  %v2813_v32 = vpop.f32.mrb[9].mxu1 }
 0x5ed   :  { %v2179_v39 = vpop.f32.mrb[10].mxu1 }
 0x5ee   :  { %2182 = vst [vmem:[%s3480_s13] sm:$0x3] %v2177_v37  ;;  %v2814_v34 = vpop.f32.mrb[11].mxu1 }
 0x5ef   :  { %2187 = vsyncpa [#allocation4], 1 }
 0x5f0   :  { %2188 = vsyncpa [#allocation6], 1 }
 0x5f1   :  { %2189 = vsyncpa [#allocation9], 1 }

</bundles_post_ra>
